<compile_context>
chip_gen: v5e
topology: v5e:2x2
jax: 0.10.0
libtpu: 0.0.40
codegen_flags: <defaults>
</compile_context>

<pallas_src>
import functools

import jax
import jax.numpy as jnp
from jax.experimental import pallas as pl
from jax.experimental.pallas import tpu as pltpu

NEG_SLOPE = 0.01  # PyTorch nn.LeakyReLU default negative_slope


def _apply_act(acc, act):
    if act == "leaky_relu":
        return jnp.where(acc >= 0.0, acc, NEG_SLOPE * acc)
    if act == "sigmoid":
        # exp + reciprocal both go to the EUP slot; clamp keeps output <= 1.0
        # under the approximate reciprocal.
        sig = pl.reciprocal(1.0 + jnp.exp(-acc), approx=True)
        return jnp.minimum(sig, 1.0)
    return acc


# ----------------------------------------------------------------------------
# Pallas kernel: batched, lane-dense (W @ X + b) with fused activation.
#   w: (P, Co, K) bf16   x: (P, K, M) bf16   b: (Co, 1) f32  ->  (P, Co, M) f32
# ----------------------------------------------------------------------------
def _gemm_bias_act_kernel(w_ref, x_ref, b_ref, o_ref, *, act):
    P = w_ref.shape[0]
    for p in range(P):  # static unroll over the (small) GEMM batch
        acc = jnp.dot(w_ref[p], x_ref[p], preferred_element_type=jnp.float32)
        acc = acc + b_ref[...]                 # (Co, 1) broadcasts over lanes
        o_ref[p] = _apply_act(acc, act).astype(o_ref.dtype)


def gemm_bias_act(w, x, b, act="none"):
    """w: (P, Co, K), x: (P, K, M), b: (Co,) -> (P, Co, M) float32."""
    P, Co, K = w.shape
    M = x.shape[2]
    # Tile the lane-dense M dim when large (parallel grid axis / v7x megacore);
    # otherwise a single full-width block (one grid step).
    tm = 512 if (M >= 1024 and M % 512 == 0) else M
    nm = M // tm
    return pl.pallas_call(
        functools.partial(_gemm_bias_act_kernel, act=act),
        out_shape=jax.ShapeDtypeStruct((P, Co, M), jnp.float32),
        grid=(nm,),
        in_specs=[
            pl.BlockSpec((P, Co, K), lambda m: (0, 0, 0)),
            pl.BlockSpec((P, K, tm), lambda m: (0, 0, m)),
            pl.BlockSpec((Co, 1), lambda m: (0, 0)),
        ],
        out_specs=pl.BlockSpec((P, Co, tm), lambda m: (0, 0, m)),
        compiler_params=pltpu.CompilerParams(
            dimension_semantics=("parallel",),
            vmem_limit_bytes=32 * 1024 * 1024),
    )(w.astype(jnp.bfloat16), x.astype(jnp.bfloat16),
      b.reshape(Co, 1).astype(jnp.float32))


# ----------------------------------------------------------------------------
# Fused encoder-fc -> decoder-fc kernel (no nonlinearity between them).
# ----------------------------------------------------------------------------
def _fc_pair_kernel(x_ref, w1_ref, b1_ref, w2_ref, b2_ref, o_ref):
    z = jnp.dot(x_ref[...], w1_ref[...], preferred_element_type=jnp.float32)
    z = z + b1_ref[...]
    h = jnp.dot(z.astype(jnp.bfloat16), w2_ref[...],
                preferred_element_type=jnp.float32)
    o_ref[...] = (h + b2_ref[...]).astype(o_ref.dtype)


def fc_pair(x, w1, b1, w2, b2):
    """(x @ w1.T + b1) @ w2.T + b2 in one kernel.
    x:(N,D1); w1:(H,D1); b1:(H,); w2:(D2,H); b2:(D2,) -> (N,D2)."""
    N, _ = x.shape
    H = w1.shape[0]
    D2 = w2.shape[0]
    vmem = pl.BlockSpec(memory_space=pltpu.MemorySpace.VMEM)
    return pl.pallas_call(
        _fc_pair_kernel,
        out_shape=jax.ShapeDtypeStruct((N, D2), jnp.float32),
        in_specs=[vmem] * 5,
        out_specs=vmem,
        compiler_params=pltpu.CompilerParams(
            vmem_limit_bytes=32 * 1024 * 1024),
    )(x.astype(jnp.bfloat16),
      w1.T.astype(jnp.bfloat16), b1.reshape(1, H).astype(jnp.float32),
      w2.T.astype(jnp.bfloat16), b2.reshape(1, D2).astype(jnp.float32))


# ----------------------------------------------------------------------------
# Conv2d(k=4, s=2, p=1) on channel-major activations (C, N, H, W)
# ----------------------------------------------------------------------------
def conv2d_s2(h, W, b, act):
    """h: (Cin, N, H, W); W: (Cout, Cin, 4, 4) (PyTorch layout); b: (Cout,)."""
    Cin, N, H, Wd = h.shape
    Cout, _, k, _ = W.shape
    Ho, Wo = H // 2, Wd // 2
    hp = jnp.pad(h, ((0, 0), (0, 0), (1, 1), (1, 1)))
    pats = []
    for ki in range(k):
        for kj in range(k):
            pats.append(hp[:, :,
                           ki:ki + 2 * (Ho - 1) + 1:2,
                           kj:kj + 2 * (Wo - 1) + 1:2])      # (Cin, N, Ho, Wo)
    cols = jnp.stack(pats, axis=0).reshape(k * k * Cin, N * Ho * Wo)
    Wm = W.transpose(0, 2, 3, 1).reshape(Cout, k * k * Cin)  # K order (ki,kj,ci)
    out = gemm_bias_act(Wm[None], cols[None], b, act)[0]     # (Cout, M)
    return out.reshape(Cout, N, Ho, Wo)


# ----------------------------------------------------------------------------
# ConvTranspose2d(k=4, s=2, p=1) via sub-pixel phase decomposition.
#   out[2m + r] gathers x[m + delta] * W[..., kh, ...] with:
_PHASE_TAPS = {0: ((0, 1), (-1, 3)), 1: ((1, 0), (0, 2))}   # (delta, kernel tap)
# ----------------------------------------------------------------------------
def conv_transpose2d_s2(h, Wt, b, act):
    """h: (Cin, N, H, W); Wt: (Cin, Cout, 4, 4) (PyTorch ConvTranspose2d
    layout); b: (Cout,).  Returns (Cout, N, 2H, 2W)."""
    Cin, N, H, Wd = h.shape
    Cout = Wt.shape[1]
    hp = jnp.pad(h, ((0, 0), (0, 0), (1, 1), (1, 1)))

    def patch(d, e):   # x[:, :, m+d, l+e] with zero padding outside the range
        return hp[:, :, 1 + d:1 + d + H, 1 + e:1 + e + Wd]   # (Cin, N, H, W)

    cols_list, w_list = [], []
    for r in (0, 1):
        for s in (0, 1):
            pats, wmats = [], []
            for (d, kh) in _PHASE_TAPS[r]:
                for (e, kw) in _PHASE_TAPS[s]:
                    pats.append(patch(d, e))
                    wmats.append(Wt[:, :, kh, kw])            # (Cin, Cout)
            cols_list.append(jnp.stack(pats, 0).reshape(4 * Cin, N * H * Wd))
            w_list.append(jnp.stack(wmats, 0)                 # (4, Cin, Cout)
                          .transpose(2, 0, 1).reshape(Cout, 4 * Cin))
    cols_all = jnp.stack(cols_list, 0)                        # (4, 4*Cin, M)
    w_all = jnp.stack(w_list, 0)                              # (4, Cout, 4*Cin)
    out = gemm_bias_act(w_all, cols_all, b, act)              # (4, Cout, M)
    out = out.reshape(2, 2, Cout, N, H, Wd)
    out = out.transpose(2, 3, 4, 0, 5, 1).reshape(Cout, N, 2 * H, 2 * Wd)
    return out


# ----------------------------------------------------------------------------
# Parameter construction (deterministic, shapes from AE.__init__)
# ----------------------------------------------------------------------------
def init_ae_params(key, depth, in_ch, spatial, hidden_dim):
    keys = iter(jax.random.split(key, 64))

    def w(shape, scale=0.05):
        return (scale * jax.random.normal(next(keys), shape)).astype(jnp.float32)

    params = {}
    enc_conv = []
    c_prev = in_ch
    for d in range(depth):
        c_out = 12 * (2 ** d) if d > 0 else 12
        enc_conv.append((w((c_out, c_prev, 4, 4)), w((c_out,))))
        c_prev = c_out
    params["enc_conv"] = enc_conv

    conv_spatial = spatial // (2 ** depth)
    conv_dim = c_prev * conv_spatial * conv_spatial

    params["enc_fc"] = (w((hidden_dim, conv_dim)), w((hidden_dim,)))
    params["dec_fc"] = (w((conv_dim, hidden_dim)), w((conv_dim,)))

    dec_deconv = []
    for d in range(depth):
        cin = 2 ** (depth - d - 1) * 12
        cout = 2 ** (depth - d - 2) * 12 if d < depth - 1 else in_ch
        dec_deconv.append((w((cin, cout, 4, 4)), w((cout,))))
    params["dec_deconv"] = dec_deconv

    params["conv_shape"] = (c_prev, conv_spatial, conv_spatial)
    return params


# ----------------------------------------------------------------------------
# AE forward pass (mirrors encoder -> decoder of the PyTorch module)
# ----------------------------------------------------------------------------
def ae_forward(x, params):
    N = x.shape[0]
    h = x.transpose(1, 0, 2, 3)                       # NCHW -> (C, N, H, W)
    # ---- encoder: depth x (Conv2d(k=4,s=2,p=1) + LeakyReLU) ----
    for (W, b) in params["enc_conv"]:
        h = conv2d_s2(h, W, b, act="leaky_relu")
    # ---- encoder fc (Flatten + Linear) fused with decoder fc (Linear) ----
    C, Hs, Ws = params["conv_shape"]
    flat = h.transpose(1, 0, 2, 3).reshape(N, C * Hs * Ws)   # PyTorch Flatten order
    Wfc, bfc = params["enc_fc"]
    Wdf, bdf = params["dec_fc"]
    h = fc_pair(flat, Wfc, bfc, Wdf, bdf)             # (N, conv_dim)
    h = h.reshape(N, C, Hs, Ws).transpose(1, 0, 2, 3)  # -> (C, N, Hs, Ws)
    # ---- decoder: (depth-1) x (ConvT + LeakyReLU), then ConvT + Sigmoid ----
    n_deconv = len(params["dec_deconv"])
    for d, (Wt, bt) in enumerate(params["dec_deconv"]):
        act = "leaky_relu" if d < n_deconv - 1 else "sigmoid"
        h = conv_transpose2d_s2(h, Wt, bt, act=act)
    return h.transpose(1, 0, 2, 3)                    # back to NCHW


# ----------------------------------------------------------------------------
if __name__ == "__main__":
    # Small shapes consistent with the module: depth=3 halves spatial 3 times
    # (16 -> 2 at the bottleneck); hidden_dim kept small (32).
    BATCH, CH, SPATIAL, HIDDEN, DEPTH = 2, 3, 16, 32, 3

    key = jax.random.PRNGKey(0)
    k_x, k_p = jax.random.split(key)
    x = jax.random.uniform(k_x, (BATCH, CH, SPATIAL, SPATIAL), dtype=jnp.float32)
    params = init_ae_params(k_p, DEPTH, CH, SPATIAL, HIDDEN)

    fwd = jax.jit(lambda xx: ae_forward(xx, params))
    out = jax.block_until_ready(fwd(x))

    assert out.shape == (BATCH, CH, SPATIAL, SPATIAL), out.shape
    assert out.dtype == jnp.float32
    assert bool(jnp.all(jnp.isfinite(out)))
    assert bool(jnp.all((out >= 0.0) & (out <= 1.0)))   # sigmoid output range
    print("KERNEL_OK")
</pallas_src>

<mosaic_0001>
module attributes {stable_mosaic.version = 11 : i64} {
  func.func @_gemm_bias_act_kernel(%arg0: i32, %arg1: memref<1x12x48xbf16, #tpu.memory_space<vmem>>, %arg2: memref<1x48x128xbf16, #tpu.memory_space<vmem>>, %arg3: memref<12x1xf32, #tpu.memory_space<vmem>>, %arg4: memref<1x12x128xf32, #tpu.memory_space<vmem>>) attributes {dimension_semantics = [#tpu.dimension_semantics<parallel>], iteration_bounds = array<i64: 1>, scalar_prefetch = 0 : i64, scratch_operands = 0 : i64, tpu.core_type = #tpu.core_type<tc>, window_params = [{pipeline_mode = #tpu.pipeline_mode<synchronous>, transform_indices = @transform_0, window_bounds = array<i64: 1, 12, 48>}, {transform_indices = @transform_1, window_bounds = array<i64: 1, 48, 128>}, {pipeline_mode = #tpu.pipeline_mode<synchronous>, transform_indices = @transform_2, window_bounds = array<i64: 12, 1>}, {transform_indices = @transform_3, window_bounds = array<i64: 1, 12, 128>}]} {
    %c0 = arith.constant 0 : index
    %c0_0 = arith.constant 0 : index
    %c0_1 = arith.constant 0 : index
    %0 = vector.load %arg1[%c0, %c0_0, %c0_1] : memref<1x12x48xbf16, #tpu.memory_space<vmem>>, vector<1x12x48xbf16>
    %1 = vector.shape_cast %0 : vector<1x12x48xbf16> to vector<12x48xbf16>
    %c0_2 = arith.constant 0 : index
    %c0_3 = arith.constant 0 : index
    %c0_4 = arith.constant 0 : index
    %2 = vector.load %arg2[%c0_2, %c0_3, %c0_4] : memref<1x48x128xbf16, #tpu.memory_space<vmem>>, vector<1x48x128xbf16>
    %3 = vector.shape_cast %2 : vector<1x48x128xbf16> to vector<48x128xbf16>
    %cst = arith.constant dense<0.000000e+00> : vector<12x128xf32>
    %4 = tpu.matmul %1, %3, %cst {dimension_numbers = #tpu.dot_dimension_numbers<[1], [0], [0], [1], [0, 0, 1, 1], [], []>} : vector<12x48xbf16>, vector<48x128xbf16>, vector<12x128xf32> -> vector<12x128xf32>
    %c0_5 = arith.constant 0 : index
    %c0_6 = arith.constant 0 : index
    %5 = vector.load %arg3[%c0_5, %c0_6] : memref<12x1xf32, #tpu.memory_space<vmem>>, vector<12x1xf32>
    %6 = vector.broadcast %5 : vector<12x1xf32> to vector<12x128xf32>
    %7 = arith.addf %4, %6 : vector<12x128xf32>
    %cst_7 = arith.constant 0.000000e+00 : f32
    %8 = vector.broadcast %cst_7 : f32 to vector<12x128xf32>
    %9 = arith.cmpf oge, %7, %8 : vector<12x128xf32>
    %cst_8 = arith.constant 0.00999999977 : f32
    %10 = vector.broadcast %cst_8 : f32 to vector<12x128xf32>
    %11 = arith.mulf %10, %7 : vector<12x128xf32>
    %12 = arith.select %9, %7, %11 : vector<12x128xi1>, vector<12x128xf32>
    %c0_9 = arith.constant 0 : index
    %c0_10 = arith.constant 0 : index
    %c0_11 = arith.constant 0 : index
    %13 = vector.load %arg4[%c0_9, %c0_10, %c0_11] : memref<1x12x128xf32, #tpu.memory_space<vmem>>, vector<1x12x128xf32>
    %14 = vector.shape_cast %13 : vector<1x12x128xf32> to vector<12x128xf32>
    %15 = vector.shape_cast %12 : vector<12x128xf32> to vector<1x12x128xf32>
    tpu.vector_store %arg4[%c0_9, %c0_10, %c0_11], %15 {strides = array<i32>} : memref<1x12x128xf32, #tpu.memory_space<vmem>>, vector<1x12x128xf32>,
    return
  }
  func.func @transform_0(%arg0: i32) -> (i32, i32, i32) {
    %c0_i32 = arith.constant 0 : i32
    %c0_i32_0 = arith.constant 0 : i32
    %c0_i32_1 = arith.constant 0 : i32
    %c0_i32_2 = arith.constant 0 : i32
    return %c0_i32, %c0_i32_0, %c0_i32_1 : i32, i32, i32
  }
  func.func @transform_1(%arg0: i32) -> (i32, i32, i32) {
    %c0_i32 = arith.constant 0 : i32
    %c0_i32_0 = arith.constant 0 : i32
    %c0_i32_1 = arith.constant 0 : i32
    return %c0_i32, %c0_i32_0, %arg0 : i32, i32, i32
  }
  func.func @transform_2(%arg0: i32) -> (i32, i32) {
    %c0_i32 = arith.constant 0 : i32
    %c0_i32_0 = arith.constant 0 : i32
    %c0_i32_1 = arith.constant 0 : i32
    return %c0_i32, %c0_i32_0 : i32, i32
  }
  func.func @transform_3(%arg0: i32) -> (i32, i32, i32) {
    %c0_i32 = arith.constant 0 : i32
    %c0_i32_0 = arith.constant 0 : i32
    %c0_i32_1 = arith.constant 0 : i32
    return %c0_i32, %c0_i32_0, %arg0 : i32, i32, i32
  }
}

module attributes {stable_mosaic.version = 11 : i64} {
  func.func @_gemm_bias_act_kernel(%arg0: i32, %arg1: memref<1x24x192xbf16, #tpu.memory_space<vmem>>, %arg2: memref<1x192x32xbf16, #tpu.memory_space<vmem>>, %arg3: memref<24x1xf32, #tpu.memory_space<vmem>>, %arg4: memref<1x24x32xf32, #tpu.memory_space<vmem>>) attributes {dimension_semantics = [#tpu.dimension_semantics<parallel>], iteration_bounds = array<i64: 1>, scalar_prefetch = 0 : i64, scratch_operands = 0 : i64, tpu.core_type = #tpu.core_type<tc>, window_params = [{pipeline_mode = #tpu.pipeline_mode<synchronous>, transform_indices = @transform_0, window_bounds = array<i64: 1, 24, 192>}, {transform_indices = @transform_1, window_bounds = array<i64: 1, 192, 32>}, {pipeline_mode = #tpu.pipeline_mode<synchronous>, transform_indices = @transform_2, window_bounds = array<i64: 24, 1>}, {transform_indices = @transform_3, window_bounds = array<i64: 1, 24, 32>}]} {
    %c0 = arith.constant 0 : index
    %c0_0 = arith.constant 0 : index
    %c0_1 = arith.constant 0 : index
    %0 = vector.load %arg1[%c0, %c0_0, %c0_1] : memref<1x24x192xbf16, #tpu.memory_space<vmem>>, vector<1x24x192xbf16>
    %1 = vector.shape_cast %0 : vector<1x24x192xbf16> to vector<24x192xbf16>
    %c0_2 = arith.constant 0 : index
    %c0_3 = arith.constant 0 : index
    %c0_4 = arith.constant 0 : index
    %2 = vector.load %arg2[%c0_2, %c0_3, %c0_4] : memref<1x192x32xbf16, #tpu.memory_space<vmem>>, vector<1x192x32xbf16>
    %3 = vector.shape_cast %2 : vector<1x192x32xbf16> to vector<192x32xbf16>
    %cst = arith.constant dense<0.000000e+00> : vector<24x32xf32>
    %4 = tpu.matmul %1, %3, %cst {dimension_numbers = #tpu.dot_dimension_numbers<[1], [0], [0], [1], [0, 0, 1, 1], [], []>} : vector<24x192xbf16>, vector<192x32xbf16>, vector<24x32xf32> -> vector<24x32xf32>
    %c0_5 = arith.constant 0 : index
    %c0_6 = arith.constant 0 : index
    %5 = vector.load %arg3[%c0_5, %c0_6] : memref<24x1xf32, #tpu.memory_space<vmem>>, vector<24x1xf32>
    %6 = vector.broadcast %5 : vector<24x1xf32> to vector<24x32xf32>
    %7 = arith.addf %4, %6 : vector<24x32xf32>
    %cst_7 = arith.constant 0.000000e+00 : f32
    %8 = vector.broadcast %cst_7 : f32 to vector<24x32xf32>
    %9 = arith.cmpf oge, %7, %8 : vector<24x32xf32>
    %cst_8 = arith.constant 0.00999999977 : f32
    %10 = vector.broadcast %cst_8 : f32 to vector<24x32xf32>
    %11 = arith.mulf %10, %7 : vector<24x32xf32>
    %12 = arith.select %9, %7, %11 : vector<24x32xi1>, vector<24x32xf32>
    %c0_9 = arith.constant 0 : index
    %c0_10 = arith.constant 0 : index
    %c0_11 = arith.constant 0 : index
    %13 = vector.load %arg4[%c0_9, %c0_10, %c0_11] : memref<1x24x32xf32, #tpu.memory_space<vmem>>, vector<1x24x32xf32>
    %14 = vector.shape_cast %13 : vector<1x24x32xf32> to vector<24x32xf32>
    %15 = vector.shape_cast %12 : vector<24x32xf32> to vector<1x24x32xf32>
    tpu.vector_store %arg4[%c0_9, %c0_10, %c0_11], %15 {strides = array<i32>} : memref<1x24x32xf32, #tpu.memory_space<vmem>>, vector<1x24x32xf32>,
    return
  }
  func.func @transform_0(%arg0: i32) -> (i32, i32, i32) {
    %c0_i32 = arith.constant 0 : i32
    %c0_i32_0 = arith.constant 0 : i32
    %c0_i32_1 = arith.constant 0 : i32
    %c0_i32_2 = arith.constant 0 : i32
    return %c0_i32, %c0_i32_0, %c0_i32_1 : i32, i32, i32
  }
  func.func @transform_1(%arg0: i32) -> (i32, i32, i32) {
    %c0_i32 = arith.constant 0 : i32
    %c0_i32_0 = arith.constant 0 : i32
    %c0_i32_1 = arith.constant 0 : i32
    return %c0_i32, %c0_i32_0, %arg0 : i32, i32, i32
  }
  func.func @transform_2(%arg0: i32) -> (i32, i32) {
    %c0_i32 = arith.constant 0 : i32
    %c0_i32_0 = arith.constant 0 : i32
    %c0_i32_1 = arith.constant 0 : i32
    return %c0_i32, %c0_i32_0 : i32, i32
  }
  func.func @transform_3(%arg0: i32) -> (i32, i32, i32) {
    %c0_i32 = arith.constant 0 : i32
    %c0_i32_0 = arith.constant 0 : i32
    %c0_i32_1 = arith.constant 0 : i32
    return %c0_i32, %c0_i32_0, %arg0 : i32, i32, i32
  }
}

module attributes {stable_mosaic.version = 11 : i64} {
  func.func @_gemm_bias_act_kernel(%arg0: i32, %arg1: memref<1x48x384xbf16, #tpu.memory_space<vmem>>, %arg2: memref<1x384x8xbf16, #tpu.memory_space<vmem>>, %arg3: memref<48x1xf32, #tpu.memory_space<vmem>>, %arg4: memref<1x48x8xf32, #tpu.memory_space<vmem>>) attributes {dimension_semantics = [#tpu.dimension_semantics<parallel>], iteration_bounds = array<i64: 1>, scalar_prefetch = 0 : i64, scratch_operands = 0 : i64, tpu.core_type = #tpu.core_type<tc>, window_params = [{pipeline_mode = #tpu.pipeline_mode<synchronous>, transform_indices = @transform_0, window_bounds = array<i64: 1, 48, 384>}, {transform_indices = @transform_1, window_bounds = array<i64: 1, 384, 8>}, {pipeline_mode = #tpu.pipeline_mode<synchronous>, transform_indices = @transform_2, window_bounds = array<i64: 48, 1>}, {transform_indices = @transform_3, window_bounds = array<i64: 1, 48, 8>}]} {
    %c0 = arith.constant 0 : index
    %c0_0 = arith.constant 0 : index
    %c0_1 = arith.constant 0 : index
    %0 = vector.load %arg1[%c0, %c0_0, %c0_1] : memref<1x48x384xbf16, #tpu.memory_space<vmem>>, vector<1x48x384xbf16>
    %1 = vector.shape_cast %0 : vector<1x48x384xbf16> to vector<48x384xbf16>
    %c0_2 = arith.constant 0 : index
    %c0_3 = arith.constant 0 : index
    %c0_4 = arith.constant 0 : index
    %2 = vector.load %arg2[%c0_2, %c0_3, %c0_4] : memref<1x384x8xbf16, #tpu.memory_space<vmem>>, vector<1x384x8xbf16>
    %3 = vector.shape_cast %2 : vector<1x384x8xbf16> to vector<384x8xbf16>
    %cst = arith.constant dense<0.000000e+00> : vector<48x8xf32>
    %4 = tpu.matmul %1, %3, %cst {dimension_numbers = #tpu.dot_dimension_numbers<[1], [0], [0], [1], [0, 0, 1, 1], [], []>} : vector<48x384xbf16>, vector<384x8xbf16>, vector<48x8xf32> -> vector<48x8xf32>
    %c0_5 = arith.constant 0 : index
    %c0_6 = arith.constant 0 : index
    %5 = vector.load %arg3[%c0_5, %c0_6] : memref<48x1xf32, #tpu.memory_space<vmem>>, vector<48x1xf32>
    %6 = vector.broadcast %5 : vector<48x1xf32> to vector<48x8xf32>
    %7 = arith.addf %4, %6 : vector<48x8xf32>
    %cst_7 = arith.constant 0.000000e+00 : f32
    %8 = vector.broadcast %cst_7 : f32 to vector<48x8xf32>
    %9 = arith.cmpf oge, %7, %8 : vector<48x8xf32>
    %cst_8 = arith.constant 0.00999999977 : f32
    %10 = vector.broadcast %cst_8 : f32 to vector<48x8xf32>
    %11 = arith.mulf %10, %7 : vector<48x8xf32>
    %12 = arith.select %9, %7, %11 : vector<48x8xi1>, vector<48x8xf32>
    %c0_9 = arith.constant 0 : index
    %c0_10 = arith.constant 0 : index
    %c0_11 = arith.constant 0 : index
    %13 = vector.load %arg4[%c0_9, %c0_10, %c0_11] : memref<1x48x8xf32, #tpu.memory_space<vmem>>, vector<1x48x8xf32>
    %14 = vector.shape_cast %13 : vector<1x48x8xf32> to vector<48x8xf32>
    %15 = vector.shape_cast %12 : vector<48x8xf32> to vector<1x48x8xf32>
    tpu.vector_store %arg4[%c0_9, %c0_10, %c0_11], %15 {strides = array<i32>} : memref<1x48x8xf32, #tpu.memory_space<vmem>>, vector<1x48x8xf32>,
    return
  }
  func.func @transform_0(%arg0: i32) -> (i32, i32, i32) {
    %c0_i32 = arith.constant 0 : i32
    %c0_i32_0 = arith.constant 0 : i32
    %c0_i32_1 = arith.constant 0 : i32
    %c0_i32_2 = arith.constant 0 : i32
    return %c0_i32, %c0_i32_0, %c0_i32_1 : i32, i32, i32
  }
  func.func @transform_1(%arg0: i32) -> (i32, i32, i32) {
    %c0_i32 = arith.constant 0 : i32
    %c0_i32_0 = arith.constant 0 : i32
    %c0_i32_1 = arith.constant 0 : i32
    return %c0_i32, %c0_i32_0, %arg0 : i32, i32, i32
  }
  func.func @transform_2(%arg0: i32) -> (i32, i32) {
    %c0_i32 = arith.constant 0 : i32
    %c0_i32_0 = arith.constant 0 : i32
    %c0_i32_1 = arith.constant 0 : i32
    return %c0_i32, %c0_i32_0 : i32, i32
  }
  func.func @transform_3(%arg0: i32) -> (i32, i32, i32) {
    %c0_i32 = arith.constant 0 : i32
    %c0_i32_0 = arith.constant 0 : i32
    %c0_i32_1 = arith.constant 0 : i32
    return %c0_i32, %c0_i32_0, %arg0 : i32, i32, i32
  }
}

module attributes {stable_mosaic.version = 11 : i64} {
  func.func @_fc_pair_kernel(%arg0: memref<2x192xbf16, #tpu.memory_space<vmem>>, %arg1: memref<192x32xbf16, #tpu.memory_space<vmem>>, %arg2: memref<1x32xf32, #tpu.memory_space<vmem>>, %arg3: memref<32x192xbf16, #tpu.memory_space<vmem>>, %arg4: memref<1x192xf32, #tpu.memory_space<vmem>>, %arg5: memref<2x192xf32, #tpu.memory_space<vmem>>) attributes {dimension_semantics = [], scalar_prefetch = 0 : i64, scratch_operands = 0 : i64, tpu.core_type = #tpu.core_type<tc>} {
    %c0 = arith.constant 0 : index
    %c0_0 = arith.constant 0 : index
    %0 = vector.load %arg0[%c0, %c0_0] : memref<2x192xbf16, #tpu.memory_space<vmem>>, vector<2x192xbf16>
    %c0_1 = arith.constant 0 : index
    %c0_2 = arith.constant 0 : index
    %1 = vector.load %arg1[%c0_1, %c0_2] : memref<192x32xbf16, #tpu.memory_space<vmem>>, vector<192x32xbf16>
    %cst = arith.constant dense<0.000000e+00> : vector<2x32xf32>
    %2 = tpu.matmul %0, %1, %cst {dimension_numbers = #tpu.dot_dimension_numbers<[1], [0], [0], [1], [0, 0, 1, 1], [], []>} : vector<2x192xbf16>, vector<192x32xbf16>, vector<2x32xf32> -> vector<2x32xf32>
    %c0_3 = arith.constant 0 : index
    %c0_4 = arith.constant 0 : index
    %3 = vector.load %arg2[%c0_3, %c0_4] : memref<1x32xf32, #tpu.memory_space<vmem>>, vector<1x32xf32>
    %4 = vector.broadcast %3 : vector<1x32xf32> to vector<2x32xf32>
    %5 = arith.addf %2, %4 : vector<2x32xf32>
    %6 = arith.truncf %5 : vector<2x32xf32> to vector<2x32xbf16>
    %c0_5 = arith.constant 0 : index
    %c0_6 = arith.constant 0 : index
    %7 = vector.load %arg3[%c0_5, %c0_6] : memref<32x192xbf16, #tpu.memory_space<vmem>>, vector<32x192xbf16>
    %cst_7 = arith.constant dense<0.000000e+00> : vector<2x192xf32>
    %8 = tpu.matmul %6, %7, %cst_7 {dimension_numbers = #tpu.dot_dimension_numbers<[1], [0], [0], [1], [0, 0, 1, 1], [], []>} : vector<2x32xbf16>, vector<32x192xbf16>, vector<2x192xf32> -> vector<2x192xf32>
    %c0_8 = arith.constant 0 : index
    %c0_9 = arith.constant 0 : index
    %9 = vector.load %arg4[%c0_8, %c0_9] : memref<1x192xf32, #tpu.memory_space<vmem>>, vector<1x192xf32>
    %10 = vector.broadcast %9 : vector<1x192xf32> to vector<2x192xf32>
    %11 = arith.addf %8, %10 : vector<2x192xf32>
    %c0_10 = arith.constant 0 : index
    %c0_11 = arith.constant 0 : index
    %12 = vector.load %arg5[%c0_10, %c0_11] : memref<2x192xf32, #tpu.memory_space<vmem>>, vector<2x192xf32>
    tpu.vector_store %arg5[%c0_10, %c0_11], %11 {strides = array<i32>} : memref<2x192xf32, #tpu.memory_space<vmem>>, vector<2x192xf32>,
    return
  }
}

module attributes {stable_mosaic.version = 11 : i64} {
  func.func @_gemm_bias_act_kernel(%arg0: i32, %arg1: memref<4x24x192xbf16, #tpu.memory_space<vmem>>, %arg2: memref<4x192x8xbf16, #tpu.memory_space<vmem>>, %arg3: memref<24x1xf32, #tpu.memory_space<vmem>>, %arg4: memref<4x24x8xf32, #tpu.memory_space<vmem>>) attributes {dimension_semantics = [#tpu.dimension_semantics<parallel>], iteration_bounds = array<i64: 1>, scalar_prefetch = 0 : i64, scratch_operands = 0 : i64, tpu.core_type = #tpu.core_type<tc>, window_params = [{pipeline_mode = #tpu.pipeline_mode<synchronous>, transform_indices = @transform_0, window_bounds = array<i64: 4, 24, 192>}, {transform_indices = @transform_1, window_bounds = array<i64: 4, 192, 8>}, {pipeline_mode = #tpu.pipeline_mode<synchronous>, transform_indices = @transform_2, window_bounds = array<i64: 24, 1>}, {transform_indices = @transform_3, window_bounds = array<i64: 4, 24, 8>}]} {
    %c0 = arith.constant 0 : index
    %c0_0 = arith.constant 0 : index
    %c0_1 = arith.constant 0 : index
    %0 = vector.load %arg1[%c0, %c0_0, %c0_1] : memref<4x24x192xbf16, #tpu.memory_space<vmem>>, vector<1x24x192xbf16>
    %1 = vector.shape_cast %0 : vector<1x24x192xbf16> to vector<24x192xbf16>
    %c0_2 = arith.constant 0 : index
    %c0_3 = arith.constant 0 : index
    %c0_4 = arith.constant 0 : index
    %2 = vector.load %arg2[%c0_2, %c0_3, %c0_4] : memref<4x192x8xbf16, #tpu.memory_space<vmem>>, vector<1x192x8xbf16>
    %3 = vector.shape_cast %2 : vector<1x192x8xbf16> to vector<192x8xbf16>
    %cst = arith.constant dense<0.000000e+00> : vector<24x8xf32>
    %4 = tpu.matmul %1, %3, %cst {dimension_numbers = #tpu.dot_dimension_numbers<[1], [0], [0], [1], [0, 0, 1, 1], [], []>} : vector<24x192xbf16>, vector<192x8xbf16>, vector<24x8xf32> -> vector<24x8xf32>
    %c0_5 = arith.constant 0 : index
    %c0_6 = arith.constant 0 : index
    %5 = vector.load %arg3[%c0_5, %c0_6] : memref<24x1xf32, #tpu.memory_space<vmem>>, vector<24x1xf32>
    %6 = vector.broadcast %5 : vector<24x1xf32> to vector<24x8xf32>
    %7 = arith.addf %4, %6 : vector<24x8xf32>
    %cst_7 = arith.constant 0.000000e+00 : f32
    %8 = vector.broadcast %cst_7 : f32 to vector<24x8xf32>
    %9 = arith.cmpf oge, %7, %8 : vector<24x8xf32>
    %cst_8 = arith.constant 0.00999999977 : f32
    %10 = vector.broadcast %cst_8 : f32 to vector<24x8xf32>
    %11 = arith.mulf %10, %7 : vector<24x8xf32>
    %12 = arith.select %9, %7, %11 : vector<24x8xi1>, vector<24x8xf32>
    %c0_9 = arith.constant 0 : index
    %c0_10 = arith.constant 0 : index
    %c0_11 = arith.constant 0 : index
    %13 = vector.load %arg4[%c0_9, %c0_10, %c0_11] : memref<4x24x8xf32, #tpu.memory_space<vmem>>, vector<1x24x8xf32>
    %14 = vector.shape_cast %13 : vector<1x24x8xf32> to vector<24x8xf32>
    %15 = vector.shape_cast %12 : vector<24x8xf32> to vector<1x24x8xf32>
    tpu.vector_store %arg4[%c0_9, %c0_10, %c0_11], %15 {strides = array<i32>} : memref<4x24x8xf32, #tpu.memory_space<vmem>>, vector<1x24x8xf32>,
    %c1 = arith.constant 1 : index
    %c0_12 = arith.constant 0 : index
    %c0_13 = arith.constant 0 : index
    %16 = vector.load %arg1[%c1, %c0_12, %c0_13] : memref<4x24x192xbf16, #tpu.memory_space<vmem>>, vector<1x24x192xbf16>
    %17 = vector.shape_cast %16 : vector<1x24x192xbf16> to vector<24x192xbf16>
    %c1_14 = arith.constant 1 : index
    %c0_15 = arith.constant 0 : index
    %c0_16 = arith.constant 0 : index
    %18 = vector.load %arg2[%c1_14, %c0_15, %c0_16] : memref<4x192x8xbf16, #tpu.memory_space<vmem>>, vector<1x192x8xbf16>
    %19 = vector.shape_cast %18 : vector<1x192x8xbf16> to vector<192x8xbf16>
    %cst_17 = arith.constant dense<0.000000e+00> : vector<24x8xf32>
    %20 = tpu.matmul %17, %19, %cst_17 {dimension_numbers = #tpu.dot_dimension_numbers<[1], [0], [0], [1], [0, 0, 1, 1], [], []>} : vector<24x192xbf16>, vector<192x8xbf16>, vector<24x8xf32> -> vector<24x8xf32>
    %c0_18 = arith.constant 0 : index
    %c0_19 = arith.constant 0 : index
    %21 = vector.load %arg3[%c0_18, %c0_19] : memref<24x1xf32, #tpu.memory_space<vmem>>, vector<24x1xf32>
    %22 = vector.broadcast %21 : vector<24x1xf32> to vector<24x8xf32>
    %23 = arith.addf %20, %22 : vector<24x8xf32>
    %cst_20 = arith.constant 0.000000e+00 : f32
    %24 = vector.broadcast %cst_20 : f32 to vector<24x8xf32>
    %25 = arith.cmpf oge, %23, %24 : vector<24x8xf32>
    %cst_21 = arith.constant 0.00999999977 : f32
    %26 = vector.broadcast %cst_21 : f32 to vector<24x8xf32>
    %27 = arith.mulf %26, %23 : vector<24x8xf32>
    %28 = arith.select %25, %23, %27 : vector<24x8xi1>, vector<24x8xf32>
    %c1_22 = arith.constant 1 : index
    %c0_23 = arith.constant 0 : index
    %c0_24 = arith.constant 0 : index
    %29 = vector.load %arg4[%c1_22, %c0_23, %c0_24] : memref<4x24x8xf32, #tpu.memory_space<vmem>>, vector<1x24x8xf32>
    %30 = vector.shape_cast %29 : vector<1x24x8xf32> to vector<24x8xf32>
    %31 = vector.shape_cast %28 : vector<24x8xf32> to vector<1x24x8xf32>
    tpu.vector_store %arg4[%c1_22, %c0_23, %c0_24], %31 {strides = array<i32>} : memref<4x24x8xf32, #tpu.memory_space<vmem>>, vector<1x24x8xf32>,
    %c2 = arith.constant 2 : index
    %c0_25 = arith.constant 0 : index
    %c0_26 = arith.constant 0 : index
    %32 = vector.load %arg1[%c2, %c0_25, %c0_26] : memref<4x24x192xbf16, #tpu.memory_space<vmem>>, vector<1x24x192xbf16>
    %33 = vector.shape_cast %32 : vector<1x24x192xbf16> to vector<24x192xbf16>
    %c2_27 = arith.constant 2 : index
    %c0_28 = arith.constant 0 : index
    %c0_29 = arith.constant 0 : index
    %34 = vector.load %arg2[%c2_27, %c0_28, %c0_29] : memref<4x192x8xbf16, #tpu.memory_space<vmem>>, vector<1x192x8xbf16>
    %35 = vector.shape_cast %34 : vector<1x192x8xbf16> to vector<192x8xbf16>
    %cst_30 = arith.constant dense<0.000000e+00> : vector<24x8xf32>
    %36 = tpu.matmul %33, %35, %cst_30 {dimension_numbers = #tpu.dot_dimension_numbers<[1], [0], [0], [1], [0, 0, 1, 1], [], []>} : vector<24x192xbf16>, vector<192x8xbf16>, vector<24x8xf32> -> vector<24x8xf32>
    %c0_31 = arith.constant 0 : index
    %c0_32 = arith.constant 0 : index
    %37 = vector.load %arg3[%c0_31, %c0_32] : memref<24x1xf32, #tpu.memory_space<vmem>>, vector<24x1xf32>
    %38 = vector.broadcast %37 : vector<24x1xf32> to vector<24x8xf32>
    %39 = arith.addf %36, %38 : vector<24x8xf32>
    %cst_33 = arith.constant 0.000000e+00 : f32
    %40 = vector.broadcast %cst_33 : f32 to vector<24x8xf32>
    %41 = arith.cmpf oge, %39, %40 : vector<24x8xf32>
    %cst_34 = arith.constant 0.00999999977 : f32
    %42 = vector.broadcast %cst_34 : f32 to vector<24x8xf32>
    %43 = arith.mulf %42, %39 : vector<24x8xf32>
    %44 = arith.select %41, %39, %43 : vector<24x8xi1>, vector<24x8xf32>
    %c2_35 = arith.constant 2 : index
    %c0_36 = arith.constant 0 : index
    %c0_37 = arith.constant 0 : index
    %45 = vector.load %arg4[%c2_35, %c0_36, %c0_37] : memref<4x24x8xf32, #tpu.memory_space<vmem>>, vector<1x24x8xf32>
    %46 = vector.shape_cast %45 : vector<1x24x8xf32> to vector<24x8xf32>
    %47 = vector.shape_cast %44 : vector<24x8xf32> to vector<1x24x8xf32>
    tpu.vector_store %arg4[%c2_35, %c0_36, %c0_37], %47 {strides = array<i32>} : memref<4x24x8xf32, #tpu.memory_space<vmem>>, vector<1x24x8xf32>,
    %c3 = arith.constant 3 : index
    %c0_38 = arith.constant 0 : index
    %c0_39 = arith.constant 0 : index
    %48 = vector.load %arg1[%c3, %c0_38, %c0_39] : memref<4x24x192xbf16, #tpu.memory_space<vmem>>, vector<1x24x192xbf16>
    %49 = vector.shape_cast %48 : vector<1x24x192xbf16> to vector<24x192xbf16>
    %c3_40 = arith.constant 3 : index
    %c0_41 = arith.constant 0 : index
    %c0_42 = arith.constant 0 : index
    %50 = vector.load %arg2[%c3_40, %c0_41, %c0_42] : memref<4x192x8xbf16, #tpu.memory_space<vmem>>, vector<1x192x8xbf16>
    %51 = vector.shape_cast %50 : vector<1x192x8xbf16> to vector<192x8xbf16>
    %cst_43 = arith.constant dense<0.000000e+00> : vector<24x8xf32>
    %52 = tpu.matmul %49, %51, %cst_43 {dimension_numbers = #tpu.dot_dimension_numbers<[1], [0], [0], [1], [0, 0, 1, 1], [], []>} : vector<24x192xbf16>, vector<192x8xbf16>, vector<24x8xf32> -> vector<24x8xf32>
    %c0_44 = arith.constant 0 : index
    %c0_45 = arith.constant 0 : index
    %53 = vector.load %arg3[%c0_44, %c0_45] : memref<24x1xf32, #tpu.memory_space<vmem>>, vector<24x1xf32>
    %54 = vector.broadcast %53 : vector<24x1xf32> to vector<24x8xf32>
    %55 = arith.addf %52, %54 : vector<24x8xf32>
    %cst_46 = arith.constant 0.000000e+00 : f32
    %56 = vector.broadcast %cst_46 : f32 to vector<24x8xf32>
    %57 = arith.cmpf oge, %55, %56 : vector<24x8xf32>
    %cst_47 = arith.constant 0.00999999977 : f32
    %58 = vector.broadcast %cst_47 : f32 to vector<24x8xf32>
    %59 = arith.mulf %58, %55 : vector<24x8xf32>
    %60 = arith.select %57, %55, %59 : vector<24x8xi1>, vector<24x8xf32>
    %c3_48 = arith.constant 3 : index
    %c0_49 = arith.constant 0 : index
    %c0_50 = arith.constant 0 : index
    %61 = vector.load %arg4[%c3_48, %c0_49, %c0_50] : memref<4x24x8xf32, #tpu.memory_space<vmem>>, vector<1x24x8xf32>
    %62 = vector.shape_cast %61 : vector<1x24x8xf32> to vector<24x8xf32>
    %63 = vector.shape_cast %60 : vector<24x8xf32> to vector<1x24x8xf32>
    tpu.vector_store %arg4[%c3_48, %c0_49, %c0_50], %63 {strides = array<i32>} : memref<4x24x8xf32, #tpu.memory_space<vmem>>, vector<1x24x8xf32>,
    return
  }
  func.func @transform_0(%arg0: i32) -> (i32, i32, i32) {
    %c0_i32 = arith.constant 0 : i32
    %c0_i32_0 = arith.constant 0 : i32
    %c0_i32_1 = arith.constant 0 : i32
    %c0_i32_2 = arith.constant 0 : i32
    return %c0_i32, %c0_i32_0, %c0_i32_1 : i32, i32, i32
  }
  func.func @transform_1(%arg0: i32) -> (i32, i32, i32) {
    %c0_i32 = arith.constant 0 : i32
    %c0_i32_0 = arith.constant 0 : i32
    %c0_i32_1 = arith.constant 0 : i32
    return %c0_i32, %c0_i32_0, %arg0 : i32, i32, i32
  }
  func.func @transform_2(%arg0: i32) -> (i32, i32) {
    %c0_i32 = arith.constant 0 : i32
    %c0_i32_0 = arith.constant 0 : i32
    %c0_i32_1 = arith.constant 0 : i32
    return %c0_i32, %c0_i32_0 : i32, i32
  }
  func.func @transform_3(%arg0: i32) -> (i32, i32, i32) {
    %c0_i32 = arith.constant 0 : i32
    %c0_i32_0 = arith.constant 0 : i32
    %c0_i32_1 = arith.constant 0 : i32
    return %c0_i32, %c0_i32_0, %arg0 : i32, i32, i32
  }
}

module attributes {stable_mosaic.version = 11 : i64} {
  func.func @_gemm_bias_act_kernel(%arg0: i32, %arg1: memref<4x12x96xbf16, #tpu.memory_space<vmem>>, %arg2: memref<4x96x32xbf16, #tpu.memory_space<vmem>>, %arg3: memref<12x1xf32, #tpu.memory_space<vmem>>, %arg4: memref<4x12x32xf32, #tpu.memory_space<vmem>>) attributes {dimension_semantics = [#tpu.dimension_semantics<parallel>], iteration_bounds = array<i64: 1>, scalar_prefetch = 0 : i64, scratch_operands = 0 : i64, tpu.core_type = #tpu.core_type<tc>, window_params = [{pipeline_mode = #tpu.pipeline_mode<synchronous>, transform_indices = @transform_0, window_bounds = array<i64: 4, 12, 96>}, {transform_indices = @transform_1, window_bounds = array<i64: 4, 96, 32>}, {pipeline_mode = #tpu.pipeline_mode<synchronous>, transform_indices = @transform_2, window_bounds = array<i64: 12, 1>}, {transform_indices = @transform_3, window_bounds = array<i64: 4, 12, 32>}]} {
    %c0 = arith.constant 0 : index
    %c0_0 = arith.constant 0 : index
    %c0_1 = arith.constant 0 : index
    %0 = vector.load %arg1[%c0, %c0_0, %c0_1] : memref<4x12x96xbf16, #tpu.memory_space<vmem>>, vector<1x12x96xbf16>
    %1 = vector.shape_cast %0 : vector<1x12x96xbf16> to vector<12x96xbf16>
    %c0_2 = arith.constant 0 : index
    %c0_3 = arith.constant 0 : index
    %c0_4 = arith.constant 0 : index
    %2 = vector.load %arg2[%c0_2, %c0_3, %c0_4] : memref<4x96x32xbf16, #tpu.memory_space<vmem>>, vector<1x96x32xbf16>
    %3 = vector.shape_cast %2 : vector<1x96x32xbf16> to vector<96x32xbf16>
    %cst = arith.constant dense<0.000000e+00> : vector<12x32xf32>
    %4 = tpu.matmul %1, %3, %cst {dimension_numbers = #tpu.dot_dimension_numbers<[1], [0], [0], [1], [0, 0, 1, 1], [], []>} : vector<12x96xbf16>, vector<96x32xbf16>, vector<12x32xf32> -> vector<12x32xf32>
    %c0_5 = arith.constant 0 : index
    %c0_6 = arith.constant 0 : index
    %5 = vector.load %arg3[%c0_5, %c0_6] : memref<12x1xf32, #tpu.memory_space<vmem>>, vector<12x1xf32>
    %6 = vector.broadcast %5 : vector<12x1xf32> to vector<12x32xf32>
    %7 = arith.addf %4, %6 : vector<12x32xf32>
    %cst_7 = arith.constant 0.000000e+00 : f32
    %8 = vector.broadcast %cst_7 : f32 to vector<12x32xf32>
    %9 = arith.cmpf oge, %7, %8 : vector<12x32xf32>
    %cst_8 = arith.constant 0.00999999977 : f32
    %10 = vector.broadcast %cst_8 : f32 to vector<12x32xf32>
    %11 = arith.mulf %10, %7 : vector<12x32xf32>
    %12 = arith.select %9, %7, %11 : vector<12x32xi1>, vector<12x32xf32>
    %c0_9 = arith.constant 0 : index
    %c0_10 = arith.constant 0 : index
    %c0_11 = arith.constant 0 : index
    %13 = vector.load %arg4[%c0_9, %c0_10, %c0_11] : memref<4x12x32xf32, #tpu.memory_space<vmem>>, vector<1x12x32xf32>
    %14 = vector.shape_cast %13 : vector<1x12x32xf32> to vector<12x32xf32>
    %15 = vector.shape_cast %12 : vector<12x32xf32> to vector<1x12x32xf32>
    tpu.vector_store %arg4[%c0_9, %c0_10, %c0_11], %15 {strides = array<i32>} : memref<4x12x32xf32, #tpu.memory_space<vmem>>, vector<1x12x32xf32>,
    %c1 = arith.constant 1 : index
    %c0_12 = arith.constant 0 : index
    %c0_13 = arith.constant 0 : index
    %16 = vector.load %arg1[%c1, %c0_12, %c0_13] : memref<4x12x96xbf16, #tpu.memory_space<vmem>>, vector<1x12x96xbf16>
    %17 = vector.shape_cast %16 : vector<1x12x96xbf16> to vector<12x96xbf16>
    %c1_14 = arith.constant 1 : index
    %c0_15 = arith.constant 0 : index
    %c0_16 = arith.constant 0 : index
    %18 = vector.load %arg2[%c1_14, %c0_15, %c0_16] : memref<4x96x32xbf16, #tpu.memory_space<vmem>>, vector<1x96x32xbf16>
    %19 = vector.shape_cast %18 : vector<1x96x32xbf16> to vector<96x32xbf16>
    %cst_17 = arith.constant dense<0.000000e+00> : vector<12x32xf32>
    %20 = tpu.matmul %17, %19, %cst_17 {dimension_numbers = #tpu.dot_dimension_numbers<[1], [0], [0], [1], [0, 0, 1, 1], [], []>} : vector<12x96xbf16>, vector<96x32xbf16>, vector<12x32xf32> -> vector<12x32xf32>
    %c0_18 = arith.constant 0 : index
    %c0_19 = arith.constant 0 : index
    %21 = vector.load %arg3[%c0_18, %c0_19] : memref<12x1xf32, #tpu.memory_space<vmem>>, vector<12x1xf32>
    %22 = vector.broadcast %21 : vector<12x1xf32> to vector<12x32xf32>
    %23 = arith.addf %20, %22 : vector<12x32xf32>
    %cst_20 = arith.constant 0.000000e+00 : f32
    %24 = vector.broadcast %cst_20 : f32 to vector<12x32xf32>
    %25 = arith.cmpf oge, %23, %24 : vector<12x32xf32>
    %cst_21 = arith.constant 0.00999999977 : f32
    %26 = vector.broadcast %cst_21 : f32 to vector<12x32xf32>
    %27 = arith.mulf %26, %23 : vector<12x32xf32>
    %28 = arith.select %25, %23, %27 : vector<12x32xi1>, vector<12x32xf32>
    %c1_22 = arith.constant 1 : index
    %c0_23 = arith.constant 0 : index
    %c0_24 = arith.constant 0 : index
    %29 = vector.load %arg4[%c1_22, %c0_23, %c0_24] : memref<4x12x32xf32, #tpu.memory_space<vmem>>, vector<1x12x32xf32>
    %30 = vector.shape_cast %29 : vector<1x12x32xf32> to vector<12x32xf32>
    %31 = vector.shape_cast %28 : vector<12x32xf32> to vector<1x12x32xf32>
    tpu.vector_store %arg4[%c1_22, %c0_23, %c0_24], %31 {strides = array<i32>} : memref<4x12x32xf32, #tpu.memory_space<vmem>>, vector<1x12x32xf32>,
    %c2 = arith.constant 2 : index
    %c0_25 = arith.constant 0 : index
    %c0_26 = arith.constant 0 : index
    %32 = vector.load %arg1[%c2, %c0_25, %c0_26] : memref<4x12x96xbf16, #tpu.memory_space<vmem>>, vector<1x12x96xbf16>
    %33 = vector.shape_cast %32 : vector<1x12x96xbf16> to vector<12x96xbf16>
    %c2_27 = arith.constant 2 : index
    %c0_28 = arith.constant 0 : index
    %c0_29 = arith.constant 0 : index
    %34 = vector.load %arg2[%c2_27, %c0_28, %c0_29] : memref<4x96x32xbf16, #tpu.memory_space<vmem>>, vector<1x96x32xbf16>
    %35 = vector.shape_cast %34 : vector<1x96x32xbf16> to vector<96x32xbf16>
    %cst_30 = arith.constant dense<0.000000e+00> : vector<12x32xf32>
    %36 = tpu.matmul %33, %35, %cst_30 {dimension_numbers = #tpu.dot_dimension_numbers<[1], [0], [0], [1], [0, 0, 1, 1], [], []>} : vector<12x96xbf16>, vector<96x32xbf16>, vector<12x32xf32> -> vector<12x32xf32>
    %c0_31 = arith.constant 0 : index
    %c0_32 = arith.constant 0 : index
    %37 = vector.load %arg3[%c0_31, %c0_32] : memref<12x1xf32, #tpu.memory_space<vmem>>, vector<12x1xf32>
    %38 = vector.broadcast %37 : vector<12x1xf32> to vector<12x32xf32>
    %39 = arith.addf %36, %38 : vector<12x32xf32>
    %cst_33 = arith.constant 0.000000e+00 : f32
    %40 = vector.broadcast %cst_33 : f32 to vector<12x32xf32>
    %41 = arith.cmpf oge, %39, %40 : vector<12x32xf32>
    %cst_34 = arith.constant 0.00999999977 : f32
    %42 = vector.broadcast %cst_34 : f32 to vector<12x32xf32>
    %43 = arith.mulf %42, %39 : vector<12x32xf32>
    %44 = arith.select %41, %39, %43 : vector<12x32xi1>, vector<12x32xf32>
    %c2_35 = arith.constant 2 : index
    %c0_36 = arith.constant 0 : index
    %c0_37 = arith.constant 0 : index
    %45 = vector.load %arg4[%c2_35, %c0_36, %c0_37] : memref<4x12x32xf32, #tpu.memory_space<vmem>>, vector<1x12x32xf32>
    %46 = vector.shape_cast %45 : vector<1x12x32xf32> to vector<12x32xf32>
    %47 = vector.shape_cast %44 : vector<12x32xf32> to vector<1x12x32xf32>
    tpu.vector_store %arg4[%c2_35, %c0_36, %c0_37], %47 {strides = array<i32>} : memref<4x12x32xf32, #tpu.memory_space<vmem>>, vector<1x12x32xf32>,
    %c3 = arith.constant 3 : index
    %c0_38 = arith.constant 0 : index
    %c0_39 = arith.constant 0 : index
    %48 = vector.load %arg1[%c3, %c0_38, %c0_39] : memref<4x12x96xbf16, #tpu.memory_space<vmem>>, vector<1x12x96xbf16>
    %49 = vector.shape_cast %48 : vector<1x12x96xbf16> to vector<12x96xbf16>
    %c3_40 = arith.constant 3 : index
    %c0_41 = arith.constant 0 : index
    %c0_42 = arith.constant 0 : index
    %50 = vector.load %arg2[%c3_40, %c0_41, %c0_42] : memref<4x96x32xbf16, #tpu.memory_space<vmem>>, vector<1x96x32xbf16>
    %51 = vector.shape_cast %50 : vector<1x96x32xbf16> to vector<96x32xbf16>
    %cst_43 = arith.constant dense<0.000000e+00> : vector<12x32xf32>
    %52 = tpu.matmul %49, %51, %cst_43 {dimension_numbers = #tpu.dot_dimension_numbers<[1], [0], [0], [1], [0, 0, 1, 1], [], []>} : vector<12x96xbf16>, vector<96x32xbf16>, vector<12x32xf32> -> vector<12x32xf32>
    %c0_44 = arith.constant 0 : index
    %c0_45 = arith.constant 0 : index
    %53 = vector.load %arg3[%c0_44, %c0_45] : memref<12x1xf32, #tpu.memory_space<vmem>>, vector<12x1xf32>
    %54 = vector.broadcast %53 : vector<12x1xf32> to vector<12x32xf32>
    %55 = arith.addf %52, %54 : vector<12x32xf32>
    %cst_46 = arith.constant 0.000000e+00 : f32
    %56 = vector.broadcast %cst_46 : f32 to vector<12x32xf32>
    %57 = arith.cmpf oge, %55, %56 : vector<12x32xf32>
    %cst_47 = arith.constant 0.00999999977 : f32
    %58 = vector.broadcast %cst_47 : f32 to vector<12x32xf32>
    %59 = arith.mulf %58, %55 : vector<12x32xf32>
    %60 = arith.select %57, %55, %59 : vector<12x32xi1>, vector<12x32xf32>
    %c3_48 = arith.constant 3 : index
    %c0_49 = arith.constant 0 : index
    %c0_50 = arith.constant 0 : index
    %61 = vector.load %arg4[%c3_48, %c0_49, %c0_50] : memref<4x12x32xf32, #tpu.memory_space<vmem>>, vector<1x12x32xf32>
    %62 = vector.shape_cast %61 : vector<1x12x32xf32> to vector<12x32xf32>
    %63 = vector.shape_cast %60 : vector<12x32xf32> to vector<1x12x32xf32>
    tpu.vector_store %arg4[%c3_48, %c0_49, %c0_50], %63 {strides = array<i32>} : memref<4x12x32xf32, #tpu.memory_space<vmem>>, vector<1x12x32xf32>,
    return
  }
  func.func @transform_0(%arg0: i32) -> (i32, i32, i32) {
    %c0_i32 = arith.constant 0 : i32
    %c0_i32_0 = arith.constant 0 : i32
    %c0_i32_1 = arith.constant 0 : i32
    %c0_i32_2 = arith.constant 0 : i32
    return %c0_i32, %c0_i32_0, %c0_i32_1 : i32, i32, i32
  }
  func.func @transform_1(%arg0: i32) -> (i32, i32, i32) {
    %c0_i32 = arith.constant 0 : i32
    %c0_i32_0 = arith.constant 0 : i32
    %c0_i32_1 = arith.constant 0 : i32
    return %c0_i32, %c0_i32_0, %arg0 : i32, i32, i32
  }
  func.func @transform_2(%arg0: i32) -> (i32, i32) {
    %c0_i32 = arith.constant 0 : i32
    %c0_i32_0 = arith.constant 0 : i32
    %c0_i32_1 = arith.constant 0 : i32
    return %c0_i32, %c0_i32_0 : i32, i32
  }
  func.func @transform_3(%arg0: i32) -> (i32, i32, i32) {
    %c0_i32 = arith.constant 0 : i32
    %c0_i32_0 = arith.constant 0 : i32
    %c0_i32_1 = arith.constant 0 : i32
    return %c0_i32, %c0_i32_0, %arg0 : i32, i32, i32
  }
}

module attributes {stable_mosaic.version = 11 : i64} {
  func.func @_gemm_bias_act_kernel(%arg0: i32, %arg1: memref<4x3x48xbf16, #tpu.memory_space<vmem>>, %arg2: memref<4x48x128xbf16, #tpu.memory_space<vmem>>, %arg3: memref<3x1xf32, #tpu.memory_space<vmem>>, %arg4: memref<4x3x128xf32, #tpu.memory_space<vmem>>) attributes {dimension_semantics = [#tpu.dimension_semantics<parallel>], iteration_bounds = array<i64: 1>, scalar_prefetch = 0 : i64, scratch_operands = 0 : i64, tpu.core_type = #tpu.core_type<tc>, window_params = [{pipeline_mode = #tpu.pipeline_mode<synchronous>, transform_indices = @transform_0, window_bounds = array<i64: 4, 3, 48>}, {transform_indices = @transform_1, window_bounds = array<i64: 4, 48, 128>}, {pipeline_mode = #tpu.pipeline_mode<synchronous>, transform_indices = @transform_2, window_bounds = array<i64: 3, 1>}, {transform_indices = @transform_3, window_bounds = array<i64: 4, 3, 128>}]} {
    %c0 = arith.constant 0 : index
    %c0_0 = arith.constant 0 : index
    %c0_1 = arith.constant 0 : index
    %0 = vector.load %arg1[%c0, %c0_0, %c0_1] : memref<4x3x48xbf16, #tpu.memory_space<vmem>>, vector<1x3x48xbf16>
    %1 = vector.shape_cast %0 : vector<1x3x48xbf16> to vector<3x48xbf16>
    %c0_2 = arith.constant 0 : index
    %c0_3 = arith.constant 0 : index
    %c0_4 = arith.constant 0 : index
    %2 = vector.load %arg2[%c0_2, %c0_3, %c0_4] : memref<4x48x128xbf16, #tpu.memory_space<vmem>>, vector<1x48x128xbf16>
    %3 = vector.shape_cast %2 : vector<1x48x128xbf16> to vector<48x128xbf16>
    %cst = arith.constant dense<0.000000e+00> : vector<3x128xf32>
    %4 = tpu.matmul %1, %3, %cst {dimension_numbers = #tpu.dot_dimension_numbers<[1], [0], [0], [1], [0, 0, 1, 1], [], []>} : vector<3x48xbf16>, vector<48x128xbf16>, vector<3x128xf32> -> vector<3x128xf32>
    %c0_5 = arith.constant 0 : index
    %c0_6 = arith.constant 0 : index
    %5 = vector.load %arg3[%c0_5, %c0_6] : memref<3x1xf32, #tpu.memory_space<vmem>>, vector<3x1xf32>
    %6 = vector.broadcast %5 : vector<3x1xf32> to vector<3x128xf32>
    %7 = arith.addf %4, %6 : vector<3x128xf32>
    %cst_7 = arith.constant 0.000000e+00 : f32
    %8 = vector.broadcast %cst_7 : f32 to vector<3x128xf32>
    %9 = arith.subf %8, %7 : vector<3x128xf32>
    %10 = math.exp %9 : vector<3x128xf32>
    %cst_8 = arith.constant 1.000000e+00 : f32
    %11 = vector.broadcast %cst_8 : f32 to vector<3x128xf32>
    %12 = arith.addf %11, %10 : vector<3x128xf32>
    %13 = tpu.reciprocal %12 {approx = true} : vector<3x128xf32> -> vector<3x128xf32>
    %cst_9 = arith.constant 1.000000e+00 : f32
    %14 = vector.broadcast %cst_9 : f32 to vector<3x128xf32>
    %15 = arith.minimumf %13, %14 : vector<3x128xf32>
    %c0_10 = arith.constant 0 : index
    %c0_11 = arith.constant 0 : index
    %c0_12 = arith.constant 0 : index
    %16 = vector.load %arg4[%c0_10, %c0_11, %c0_12] : memref<4x3x128xf32, #tpu.memory_space<vmem>>, vector<1x3x128xf32>
    %17 = vector.shape_cast %16 : vector<1x3x128xf32> to vector<3x128xf32>
    %18 = vector.shape_cast %15 : vector<3x128xf32> to vector<1x3x128xf32>
    tpu.vector_store %arg4[%c0_10, %c0_11, %c0_12], %18 {strides = array<i32>} : memref<4x3x128xf32, #tpu.memory_space<vmem>>, vector<1x3x128xf32>,
    %c1 = arith.constant 1 : index
    %c0_13 = arith.constant 0 : index
    %c0_14 = arith.constant 0 : index
    %19 = vector.load %arg1[%c1, %c0_13, %c0_14] : memref<4x3x48xbf16, #tpu.memory_space<vmem>>, vector<1x3x48xbf16>
    %20 = vector.shape_cast %19 : vector<1x3x48xbf16> to vector<3x48xbf16>
    %c1_15 = arith.constant 1 : index
    %c0_16 = arith.constant 0 : index
    %c0_17 = arith.constant 0 : index
    %21 = vector.load %arg2[%c1_15, %c0_16, %c0_17] : memref<4x48x128xbf16, #tpu.memory_space<vmem>>, vector<1x48x128xbf16>
    %22 = vector.shape_cast %21 : vector<1x48x128xbf16> to vector<48x128xbf16>
    %cst_18 = arith.constant dense<0.000000e+00> : vector<3x128xf32>
    %23 = tpu.matmul %20, %22, %cst_18 {dimension_numbers = #tpu.dot_dimension_numbers<[1], [0], [0], [1], [0, 0, 1, 1], [], []>} : vector<3x48xbf16>, vector<48x128xbf16>, vector<3x128xf32> -> vector<3x128xf32>
    %c0_19 = arith.constant 0 : index
    %c0_20 = arith.constant 0 : index
    %24 = vector.load %arg3[%c0_19, %c0_20] : memref<3x1xf32, #tpu.memory_space<vmem>>, vector<3x1xf32>
    %25 = vector.broadcast %24 : vector<3x1xf32> to vector<3x128xf32>
    %26 = arith.addf %23, %25 : vector<3x128xf32>
    %cst_21 = arith.constant 0.000000e+00 : f32
    %27 = vector.broadcast %cst_21 : f32 to vector<3x128xf32>
    %28 = arith.subf %27, %26 : vector<3x128xf32>
    %29 = math.exp %28 : vector<3x128xf32>
    %cst_22 = arith.constant 1.000000e+00 : f32
    %30 = vector.broadcast %cst_22 : f32 to vector<3x128xf32>
    %31 = arith.addf %30, %29 : vector<3x128xf32>
    %32 = tpu.reciprocal %31 {approx = true} : vector<3x128xf32> -> vector<3x128xf32>
    %cst_23 = arith.constant 1.000000e+00 : f32
    %33 = vector.broadcast %cst_23 : f32 to vector<3x128xf32>
    %34 = arith.minimumf %32, %33 : vector<3x128xf32>
    %c1_24 = arith.constant 1 : index
    %c0_25 = arith.constant 0 : index
    %c0_26 = arith.constant 0 : index
    %35 = vector.load %arg4[%c1_24, %c0_25, %c0_26] : memref<4x3x128xf32, #tpu.memory_space<vmem>>, vector<1x3x128xf32>
    %36 = vector.shape_cast %35 : vector<1x3x128xf32> to vector<3x128xf32>
    %37 = vector.shape_cast %34 : vector<3x128xf32> to vector<1x3x128xf32>
    tpu.vector_store %arg4[%c1_24, %c0_25, %c0_26], %37 {strides = array<i32>} : memref<4x3x128xf32, #tpu.memory_space<vmem>>, vector<1x3x128xf32>,
    %c2 = arith.constant 2 : index
    %c0_27 = arith.constant 0 : index
    %c0_28 = arith.constant 0 : index
    %38 = vector.load %arg1[%c2, %c0_27, %c0_28] : memref<4x3x48xbf16, #tpu.memory_space<vmem>>, vector<1x3x48xbf16>
    %39 = vector.shape_cast %38 : vector<1x3x48xbf16> to vector<3x48xbf16>
    %c2_29 = arith.constant 2 : index
    %c0_30 = arith.constant 0 : index
    %c0_31 = arith.constant 0 : index
    %40 = vector.load %arg2[%c2_29, %c0_30, %c0_31] : memref<4x48x128xbf16, #tpu.memory_space<vmem>>, vector<1x48x128xbf16>
    %41 = vector.shape_cast %40 : vector<1x48x128xbf16> to vector<48x128xbf16>
    %cst_32 = arith.constant dense<0.000000e+00> : vector<3x128xf32>
    %42 = tpu.matmul %39, %41, %cst_32 {dimension_numbers = #tpu.dot_dimension_numbers<[1], [0], [0], [1], [0, 0, 1, 1], [], []>} : vector<3x48xbf16>, vector<48x128xbf16>, vector<3x128xf32> -> vector<3x128xf32>
    %c0_33 = arith.constant 0 : index
    %c0_34 = arith.constant 0 : index
    %43 = vector.load %arg3[%c0_33, %c0_34] : memref<3x1xf32, #tpu.memory_space<vmem>>, vector<3x1xf32>
    %44 = vector.broadcast %43 : vector<3x1xf32> to vector<3x128xf32>
    %45 = arith.addf %42, %44 : vector<3x128xf32>
    %cst_35 = arith.constant 0.000000e+00 : f32
    %46 = vector.broadcast %cst_35 : f32 to vector<3x128xf32>
    %47 = arith.subf %46, %45 : vector<3x128xf32>
    %48 = math.exp %47 : vector<3x128xf32>
    %cst_36 = arith.constant 1.000000e+00 : f32
    %49 = vector.broadcast %cst_36 : f32 to vector<3x128xf32>
    %50 = arith.addf %49, %48 : vector<3x128xf32>
    %51 = tpu.reciprocal %50 {approx = true} : vector<3x128xf32> -> vector<3x128xf32>
    %cst_37 = arith.constant 1.000000e+00 : f32
    %52 = vector.broadcast %cst_37 : f32 to vector<3x128xf32>
    %53 = arith.minimumf %51, %52 : vector<3x128xf32>
    %c2_38 = arith.constant 2 : index
    %c0_39 = arith.constant 0 : index
    %c0_40 = arith.constant 0 : index
    %54 = vector.load %arg4[%c2_38, %c0_39, %c0_40] : memref<4x3x128xf32, #tpu.memory_space<vmem>>, vector<1x3x128xf32>
    %55 = vector.shape_cast %54 : vector<1x3x128xf32> to vector<3x128xf32>
    %56 = vector.shape_cast %53 : vector<3x128xf32> to vector<1x3x128xf32>
    tpu.vector_store %arg4[%c2_38, %c0_39, %c0_40], %56 {strides = array<i32>} : memref<4x3x128xf32, #tpu.memory_space<vmem>>, vector<1x3x128xf32>,
    %c3 = arith.constant 3 : index
    %c0_41 = arith.constant 0 : index
    %c0_42 = arith.constant 0 : index
    %57 = vector.load %arg1[%c3, %c0_41, %c0_42] : memref<4x3x48xbf16, #tpu.memory_space<vmem>>, vector<1x3x48xbf16>
    %58 = vector.shape_cast %57 : vector<1x3x48xbf16> to vector<3x48xbf16>
    %c3_43 = arith.constant 3 : index
    %c0_44 = arith.constant 0 : index
    %c0_45 = arith.constant 0 : index
    %59 = vector.load %arg2[%c3_43, %c0_44, %c0_45] : memref<4x48x128xbf16, #tpu.memory_space<vmem>>, vector<1x48x128xbf16>
    %60 = vector.shape_cast %59 : vector<1x48x128xbf16> to vector<48x128xbf16>
    %cst_46 = arith.constant dense<0.000000e+00> : vector<3x128xf32>
    %61 = tpu.matmul %58, %60, %cst_46 {dimension_numbers = #tpu.dot_dimension_numbers<[1], [0], [0], [1], [0, 0, 1, 1], [], []>} : vector<3x48xbf16>, vector<48x128xbf16>, vector<3x128xf32> -> vector<3x128xf32>
    %c0_47 = arith.constant 0 : index
    %c0_48 = arith.constant 0 : index
    %62 = vector.load %arg3[%c0_47, %c0_48] : memref<3x1xf32, #tpu.memory_space<vmem>>, vector<3x1xf32>
    %63 = vector.broadcast %62 : vector<3x1xf32> to vector<3x128xf32>
    %64 = arith.addf %61, %63 : vector<3x128xf32>
    %cst_49 = arith.constant 0.000000e+00 : f32
    %65 = vector.broadcast %cst_49 : f32 to vector<3x128xf32>
    %66 = arith.subf %65, %64 : vector<3x128xf32>
    %67 = math.exp %66 : vector<3x128xf32>
    %cst_50 = arith.constant 1.000000e+00 : f32
    %68 = vector.broadcast %cst_50 : f32 to vector<3x128xf32>
    %69 = arith.addf %68, %67 : vector<3x128xf32>
    %70 = tpu.reciprocal %69 {approx = true} : vector<3x128xf32> -> vector<3x128xf32>
    %cst_51 = arith.constant 1.000000e+00 : f32
    %71 = vector.broadcast %cst_51 : f32 to vector<3x128xf32>
    %72 = arith.minimumf %70, %71 : vector<3x128xf32>
    %c3_52 = arith.constant 3 : index
    %c0_53 = arith.constant 0 : index
    %c0_54 = arith.constant 0 : index
    %73 = vector.load %arg4[%c3_52, %c0_53, %c0_54] : memref<4x3x128xf32, #tpu.memory_space<vmem>>, vector<1x3x128xf32>
    %74 = vector.shape_cast %73 : vector<1x3x128xf32> to vector<3x128xf32>
    %75 = vector.shape_cast %72 : vector<3x128xf32> to vector<1x3x128xf32>
    tpu.vector_store %arg4[%c3_52, %c0_53, %c0_54], %75 {strides = array<i32>} : memref<4x3x128xf32, #tpu.memory_space<vmem>>, vector<1x3x128xf32>,
    return
  }
  func.func @transform_0(%arg0: i32) -> (i32, i32, i32) {
    %c0_i32 = arith.constant 0 : i32
    %c0_i32_0 = arith.constant 0 : i32
    %c0_i32_1 = arith.constant 0 : i32
    %c0_i32_2 = arith.constant 0 : i32
    return %c0_i32, %c0_i32_0, %c0_i32_1 : i32, i32, i32
  }
  func.func @transform_1(%arg0: i32) -> (i32, i32, i32) {
    %c0_i32 = arith.constant 0 : i32
    %c0_i32_0 = arith.constant 0 : i32
    %c0_i32_1 = arith.constant 0 : i32
    return %c0_i32, %c0_i32_0, %arg0 : i32, i32, i32
  }
  func.func @transform_2(%arg0: i32) -> (i32, i32) {
    %c0_i32 = arith.constant 0 : i32
    %c0_i32_0 = arith.constant 0 : i32
    %c0_i32_1 = arith.constant 0 : i32
    return %c0_i32, %c0_i32_0 : i32, i32
  }
  func.func @transform_3(%arg0: i32) -> (i32, i32, i32) {
    %c0_i32 = arith.constant 0 : i32
    %c0_i32_0 = arith.constant 0 : i32
    %c0_i32_1 = arith.constant 0 : i32
    return %c0_i32, %c0_i32_0, %arg0 : i32, i32, i32
  }
}

</mosaic_0001>

<bundles_post_ra>
// kernel: squeeze.3
= control target key start
LH: loop header
LB: loop body
LE: loop exit
PB: predicated region body
PF: predicated region fallthrough
CT: control target
= control target key end

     0   :  { %s623_s8 = smov 112   ;;  %s624_s9 = smov 120   ;;  %vm3_vm0 = vcmask 64512   ;;  %s831_s0 = inlined_call_operand.vmem [shape: f32[1,12,128], index: 0, kind: input, shape index: {}]   ;;  %s832_s1 = inlined_call_operand.vmem [shape: bf16[12,2,8,8], index: 1, kind: output, shape index: {}]  }
   0x1   :  { %v36_v0 = vld [vmem:[%s831_s0] sm:$0xff]   ;;  %s625_s10 = smov 104   ;;  %v500_v1 = vld [vmem:[%s831_s0 + $0x8] sm:$0xf]   ;;  %s626_s19 = smov 96  }
   0x2   :  { %37 = vrot.lane.b32.xlu1 %v36_v0, %s623_s8  ;;  %16 = vrot.lane.b32.xlu0 %v36_v0, %s624_s9  ;;  %v499_v2 = vld [vmem:[%s831_s0 + $0x8] sm:$0xf]   ;;  %s627_s20 = smov 88   ;;  %s628_s25 = smov 80  }
   0x3   :  { %58 = vrot.lane.b32.xlu2 %v36_v0, %s625_s10  ;;  %v501_v3 = vld [vmem:[%s831_s0 + $0x8] sm:$0xf]   ;;  %s629_s28 = smov 72   ;;  %s630_s29 = smov 64  }
   0x4   :  { %v502_v4 = vld [vmem:[%s831_s0 + $0x8] sm:$0xf]   ;;  %s631_s5 = smov 56   ;;  %s634_s14 = smov 32  }
   0x5   :  { %v503_v5 = vld [vmem:[%s831_s0 + $0x8] sm:$0xf]   ;;  %4 = vst.msk [vmem:[#allocation0] ss:$16 sm:$0x3] %vm3_vm0, %v36_v0   ;;  %s635_s17 = smov 24  }
   0x6   :  { %v504_v6 = vld [vmem:[%s831_s0 + $0x8] sm:$0xf]   ;;  %5 = vst.msk [vmem:[#allocation0] ss:$16 sm:$0xc] %vm3_vm0, %v36_v0   ;;  %s636_s18 = smov 16  }
   0x7   :  { %v505_v7 = vld [vmem:[%s831_s0 + $0x8] sm:$0xf]   ;;  %6 = vst.msk [vmem:[#allocation0] ss:$16 sm:$0x30] %vm3_vm0, %v36_v0   ;;  %s637_s23 = smov 8  }
   0x8   :  { %v506_v8 = vld [vmem:[%s831_s0 + $0x8] sm:$0xf]   ;;  %7 = vst.msk [vmem:[#allocation0] ss:$16 sm:$0xc0] %vm3_vm0, %v36_v0  }
   0x9   :  { %v507_v9 = vld [vmem:[%s831_s0 + $0x8] sm:$0xf]  }
   0xa   :  { %50 = vrot.lane.b32.xlu1 %v500_v1, %s623_s8  ;;  %29 = vrot.lane.b32.xlu0 %v499_v2, %s624_s9  ;;  %v508_v10 = vld [vmem:[%s831_s0 + $0x8] sm:$0xf]   ;;  %s632_s8 = smov 48   ;;  %s633_s9 = smov 40  }
   0xb   :  { %71 = vrot.lane.b32.xlu2 %v501_v3, %s625_s10  ;;  %v509_v11 = vld [vmem:[%s831_s0 + $0x8] sm:$0xf]  }
   0xc   :  { %v510_v12 = vld [vmem:[%s831_s0 + $0x8] sm:$0xf]  }
   0xd   :  { %v511_v13 = vld [vmem:[%s831_s0 + $0x8] sm:$0xf]  }
   0xe   :  { %v512_v14 = vld [vmem:[%s831_s0 + $0x8] sm:$0xf]  }
   0xf   :  { %v513_v15 = vld [vmem:[%s831_s0 + $0x8] sm:$0xf]  }
  0x10   :  { %v498_v16 = vld [vmem:[%s831_s0 + $0x8] sm:$0xf]  }
  0x11   :  { %12 = vst.msk [vmem:[#allocation0 + $0x80] ss:$16 sm:$0x3] %vm3_vm0, %v498_v16  }
  0x12   :  { %92 = vrot.lane.b32.xlu1 %v502_v4, %s626_s19  ;;  %79 = vrot.lane.b32.xlu0 %v36_v0, %s626_s19  ;;  %14 = vst.msk [vmem:[#allocation0 + $0x80] ss:$16 sm:$0xc] %vm3_vm0, %v498_v16  }
  0x13   :  { %100 = vrot.lane.b32.xlu2 %v36_v0, %s627_s20 }
  0x1a   :  { %121 = vrot.lane.b32.xlu1 %v36_v0, %s628_s25  ;;  %113 = vrot.lane.b32.xlu0 %v503_v5, %s627_s20 }
  0x1b   :  { %134 = vrot.lane.b32.xlu2 %v504_v6, %s628_s25 }
  0x22   :  { %155 = vrot.lane.b32.xlu1 %v505_v7, %s629_s28  ;;  %142 = vrot.lane.b32.xlu0 %v36_v0, %s629_s28 }
  0x23   :  { %163 = vrot.lane.b32.xlu2 %v36_v0, %s630_s29 }
  0x2a   :  { %184 = vrot.lane.b32.xlu1 %v36_v0, %s631_s5  ;;  %176 = vrot.lane.b32.xlu0 %v506_v8, %s630_s29 }
  0x2b   :  { %197 = vrot.lane.b32.xlu2 %v507_v9, %s631_s5 }
  0x32   :  { %218 = vrot.lane.b32.xlu1 %v508_v10, %s632_s8  ;;  %205 = vrot.lane.b32.xlu0 %v36_v0, %s632_s8 }
  0x33   :  { %226 = vrot.lane.b32.xlu2 %v36_v0, %s633_s9 }
  0x3a   :  { %247 = vrot.lane.b32.xlu1 %v36_v0, %s634_s14  ;;  %239 = vrot.lane.b32.xlu0 %v509_v11, %s633_s9 }
  0x3b   :  { %260 = vrot.lane.b32.xlu2 %v510_v12, %s634_s14 }
  0x42   :  { %281 = vrot.lane.b32.xlu1 %v511_v13, %s635_s17  ;;  %268 = vrot.lane.b32.xlu0 %v36_v0, %s635_s17 }
  0x43   :  { %289 = vrot.lane.b32.xlu2 %v36_v0, %s636_s18 }
  0x4a   :  { %310 = vrot.lane.b32.xlu1 %v36_v0, %s637_s23  ;;  %302 = vrot.lane.b32.xlu0 %v512_v14, %s636_s18 }
  0x4b   :  { %323 = vrot.lane.b32.xlu2 %v513_v15, %s637_s23 }
  0x5d   :  { %v59_v17 = vpop.permute.xlu2 %58  }
  0x5e   :  { %62 = vst.msk [vmem:[#allocation0 + $0x3] ss:$16 sm:$0x3] %vm3_vm0, %v59_v17  }
  0x5f   :  { %64 = vst.msk [vmem:[#allocation0 + $0x3] ss:$16 sm:$0xc] %vm3_vm0, %v59_v17  }
  0x60   :  { %66 = vst.msk [vmem:[#allocation0 + $0x3] ss:$16 sm:$0x30] %vm3_vm0, %v59_v17  }
  0x61   :  { %68 = vst.msk [vmem:[#allocation0 + $0x3] ss:$16 sm:$0xc0] %vm3_vm0, %v59_v17  }
  0x65   :  { %v72_v18 = vpop.permute.xlu2 %71  }
  0x66   :  { %75 = vst.msk [vmem:[#allocation0 + $0x83] ss:$16 sm:$0x3] %vm3_vm0, %v72_v18  }
  0x67   :  { %77 = vst.msk [vmem:[#allocation0 + $0x83] ss:$16 sm:$0xc] %vm3_vm0, %v72_v18  }
  0x6d   :  { %v101_v19 = vpop.permute.xlu2 %100  }
  0x6e   :  { %104 = vst.msk [vmem:[#allocation0 + $0x5] ss:$16 sm:$0x3] %vm3_vm0, %v101_v19  }
  0x6f   :  { %106 = vst.msk [vmem:[#allocation0 + $0x5] ss:$16 sm:$0xc] %vm3_vm0, %v101_v19  }
  0x70   :  { %108 = vst.msk [vmem:[#allocation0 + $0x5] ss:$16 sm:$0x30] %vm3_vm0, %v101_v19  }
  0x71   :  { %110 = vst.msk [vmem:[#allocation0 + $0x5] ss:$16 sm:$0xc0] %vm3_vm0, %v101_v19  }
  0x74   :  { %v38_v20 = vpop.permute.xlu1 %37   ;;  %v17_v21 = vpop.permute.xlu0 %16  }
  0x75   :  { %41 = vst.msk [vmem:[#allocation0 + $0x2] ss:$16 sm:$0x3] %vm3_vm0, %v38_v20   ;;  %v135_v22 = vpop.permute.xlu2 %134  }
  0x76   :  { %43 = vst.msk [vmem:[#allocation0 + $0x2] ss:$16 sm:$0xc] %vm3_vm0, %v38_v20  }
  0x77   :  { %45 = vst.msk [vmem:[#allocation0 + $0x2] ss:$16 sm:$0x30] %vm3_vm0, %v38_v20  }
  0x78   :  { %47 = vst.msk [vmem:[#allocation0 + $0x2] ss:$16 sm:$0xc0] %vm3_vm0, %v38_v20  }
  0x79   :  { %20 = vst.msk [vmem:[#allocation0 + $0x1] ss:$16 sm:$0x3] %vm3_vm0, %v17_v21  }
  0x7a   :  { %22 = vst.msk [vmem:[#allocation0 + $0x1] ss:$16 sm:$0xc] %vm3_vm0, %v17_v21  }
  0x7b   :  { %24 = vst.msk [vmem:[#allocation0 + $0x1] ss:$16 sm:$0x30] %vm3_vm0, %v17_v21  }
  0x7c   :  { %26 = vst.msk [vmem:[#allocation0 + $0x1] ss:$16 sm:$0xc0] %vm3_vm0, %v17_v21   ;;  %v51_v23 = vpop.permute.xlu1 %50   ;;  %v30_v24 = vpop.permute.xlu0 %29  }
  0x7d   :  { %54 = vst.msk [vmem:[#allocation0 + $0x82] ss:$16 sm:$0x3] %vm3_vm0, %v51_v23   ;;  %v164_v25 = vpop.permute.xlu2 %163  }
  0x7e   :  { %56 = vst.msk [vmem:[#allocation0 + $0x82] ss:$16 sm:$0xc] %vm3_vm0, %v51_v23  }
  0x7f   :  { %33 = vst.msk [vmem:[#allocation0 + $0x81] ss:$16 sm:$0x3] %vm3_vm0, %v30_v24  }
  0x80   :  { %35 = vst.msk [vmem:[#allocation0 + $0x81] ss:$16 sm:$0xc] %vm3_vm0, %v30_v24  }
  0x81   :  { %138 = vst.msk [vmem:[#allocation0 + $0x86] ss:$16 sm:$0x3] %vm3_vm0, %v135_v22  }
  0x82   :  { %140 = vst.msk [vmem:[#allocation0 + $0x86] ss:$16 sm:$0xc] %vm3_vm0, %v135_v22  }
  0x83   :  { %167 = vst.msk [vmem:[#allocation0 + $0x8] ss:$16 sm:$0x3] %vm3_vm0, %v164_v25  }
  0x84   :  { %v93_v26 = vpop.permute.xlu1 %92   ;;  %v80_v27 = vpop.permute.xlu0 %79   ;;  %169 = vst.msk [vmem:[#allocation0 + $0x8] ss:$16 sm:$0xc] %vm3_vm0, %v164_v25  }
  0x85   :  { %96 = vst.msk [vmem:[#allocation0 + $0x84] ss:$16 sm:$0x3] %vm3_vm0, %v93_v26   ;;  %v198_v28 = vpop.permute.xlu2 %197  }
  0x86   :  { %98 = vst.msk [vmem:[#allocation0 + $0x84] ss:$16 sm:$0xc] %vm3_vm0, %v93_v26  }
  0x87   :  { %83 = vst.msk [vmem:[#allocation0 + $0x4] ss:$16 sm:$0x3] %vm3_vm0, %v80_v27  }
  0x88   :  { %85 = vst.msk [vmem:[#allocation0 + $0x4] ss:$16 sm:$0xc] %vm3_vm0, %v80_v27  }
  0x89   :  { %87 = vst.msk [vmem:[#allocation0 + $0x4] ss:$16 sm:$0x30] %vm3_vm0, %v80_v27  }
  0x8a   :  { %89 = vst.msk [vmem:[#allocation0 + $0x4] ss:$16 sm:$0xc0] %vm3_vm0, %v80_v27  }
  0x8b   :  { %171 = vst.msk [vmem:[#allocation0 + $0x8] ss:$16 sm:$0x30] %vm3_vm0, %v164_v25  }
  0x8c   :  { %v122_v29 = vpop.permute.xlu1 %121   ;;  %v114_v30 = vpop.permute.xlu0 %113   ;;  %173 = vst.msk [vmem:[#allocation0 + $0x8] ss:$16 sm:$0xc0] %vm3_vm0, %v164_v25  }
  0x8d   :  { %125 = vst.msk [vmem:[#allocation0 + $0x6] ss:$16 sm:$0x3] %vm3_vm0, %v122_v29   ;;  %v227_v31 = vpop.permute.xlu2 %226  }
  0x8e   :  { %127 = vst.msk [vmem:[#allocation0 + $0x6] ss:$16 sm:$0xc] %vm3_vm0, %v122_v29  }
  0x8f   :  { %129 = vst.msk [vmem:[#allocation0 + $0x6] ss:$16 sm:$0x30] %vm3_vm0, %v122_v29  }
  0x90   :  { %131 = vst.msk [vmem:[#allocation0 + $0x6] ss:$16 sm:$0xc0] %vm3_vm0, %v122_v29  }
  0x91   :  { %117 = vst.msk [vmem:[#allocation0 + $0x85] ss:$16 sm:$0x3] %vm3_vm0, %v114_v30  }
  0x92   :  { %119 = vst.msk [vmem:[#allocation0 + $0x85] ss:$16 sm:$0xc] %vm3_vm0, %v114_v30  }
  0x93   :  { %201 = vst.msk [vmem:[#allocation0 + $0x89] ss:$16 sm:$0x3] %vm3_vm0, %v198_v28  }
  0x94   :  { %v156_v32 = vpop.permute.xlu1 %155   ;;  %v143_v33 = vpop.permute.xlu0 %142   ;;  %203 = vst.msk [vmem:[#allocation0 + $0x89] ss:$16 sm:$0xc] %vm3_vm0, %v198_v28  }
  0x95   :  { %159 = vst.msk [vmem:[#allocation0 + $0x87] ss:$16 sm:$0x3] %vm3_vm0, %v156_v32   ;;  %v261_v34 = vpop.permute.xlu2 %260  }
  0x96   :  { %161 = vst.msk [vmem:[#allocation0 + $0x87] ss:$16 sm:$0xc] %vm3_vm0, %v156_v32  }
  0x97   :  { %146 = vst.msk [vmem:[#allocation0 + $0x7] ss:$16 sm:$0x3] %vm3_vm0, %v143_v33  }
  0x98   :  { %148 = vst.msk [vmem:[#allocation0 + $0x7] ss:$16 sm:$0xc] %vm3_vm0, %v143_v33  }
  0x99   :  { %150 = vst.msk [vmem:[#allocation0 + $0x7] ss:$16 sm:$0x30] %vm3_vm0, %v143_v33  }
  0x9a   :  { %152 = vst.msk [vmem:[#allocation0 + $0x7] ss:$16 sm:$0xc0] %vm3_vm0, %v143_v33  }
  0x9b   :  { %230 = vst.msk [vmem:[#allocation0 + $0xb] ss:$16 sm:$0x3] %vm3_vm0, %v227_v31  }
  0x9c   :  { %v185_v35 = vpop.permute.xlu1 %184   ;;  %v177_v36 = vpop.permute.xlu0 %176   ;;  %232 = vst.msk [vmem:[#allocation0 + $0xb] ss:$16 sm:$0xc] %vm3_vm0, %v227_v31   ;;  %v443_v8 = vld [vmem:[#allocation0 + $0x80] sm:$0xff]  ;;  %v457_v11 = vld [vmem:[#allocation0 + $0x90] sm:$0xff] }
  0x9d   :  { %188 = vst.msk [vmem:[#allocation0 + $0x9] ss:$16 sm:$0x3] %vm3_vm0, %v185_v35   ;;  %v290_v37 = vpop.permute.xlu2 %289   ;;  %v471_v14 = vld [vmem:[#allocation0 + $0xa0] sm:$0xff]  ;;  %v485_v16 = vld [vmem:[#allocation0 + $0xb0] sm:$0xff] }
  0x9e   :  { %190 = vst.msk [vmem:[#allocation0 + $0x9] ss:$16 sm:$0xc] %vm3_vm0, %v185_v35   ;;  %v332_v47 = vld [vmem:[#allocation0] sm:$0xff]  ;;  %v345_v48 = vld [vmem:[#allocation0 + $0x10] sm:$0xff] }
  0x9f   :  { %192 = vst.msk [vmem:[#allocation0 + $0x9] ss:$16 sm:$0x30] %vm3_vm0, %v185_v35   ;;  %v359_v51 = vld [vmem:[#allocation0 + $0x20] sm:$0xff]  ;;  %v373_v55 = vld [vmem:[#allocation0 + $0x30] sm:$0xff] }
  0xa0   :  { %194 = vst.msk [vmem:[#allocation0 + $0x9] ss:$16 sm:$0xc0] %vm3_vm0, %v185_v35   ;;  %v387_v59 = vld [vmem:[#allocation0 + $0x40] sm:$0xff]  ;;  %v401_v63 = vld [vmem:[#allocation0 + $0x50] sm:$0xff] }
  0xa1   :  { %180 = vst.msk [vmem:[#allocation0 + $0x88] ss:$16 sm:$0x3] %vm3_vm0, %v177_v36   ;;  %v415_v3 = vld [vmem:[#allocation0 + $0x60] sm:$0xff]  ;;  %v429_v6 = vld [vmem:[#allocation0 + $0x70] sm:$0xff] }
  0xa2   :  { %182 = vst.msk [vmem:[#allocation0 + $0x88] ss:$16 sm:$0xc] %vm3_vm0, %v177_v36  }
  0xa3   :  { %234 = vst.msk [vmem:[#allocation0 + $0xb] ss:$16 sm:$0x30] %vm3_vm0, %v227_v31  }
  0xa4   :  { %236 = vst.msk [vmem:[#allocation0 + $0xb] ss:$16 sm:$0xc0] %vm3_vm0, %v227_v31   ;;  %v219_v38 = vpop.permute.xlu1 %218   ;;  %v206_v39 = vpop.permute.xlu0 %205  }
  0xa5   :  { %222 = vst.msk [vmem:[#allocation0 + $0x8a] ss:$16 sm:$0x3] %vm3_vm0, %v219_v38   ;;  %v324_v40 = vpop.permute.xlu2 %323  }
  0xa6   :  { %224 = vst.msk [vmem:[#allocation0 + $0x8a] ss:$16 sm:$0xc] %vm3_vm0, %v219_v38  }
  0xa7   :  { %209 = vst.msk [vmem:[#allocation0 + $0xa] ss:$16 sm:$0x3] %vm3_vm0, %v206_v39  }
  0xa8   :  { %211 = vst.msk [vmem:[#allocation0 + $0xa] ss:$16 sm:$0xc] %vm3_vm0, %v206_v39  }
  0xa9   :  { %213 = vst.msk [vmem:[#allocation0 + $0xa] ss:$16 sm:$0x30] %vm3_vm0, %v206_v39  }
  0xaa   :  { %215 = vst.msk [vmem:[#allocation0 + $0xa] ss:$16 sm:$0xc0] %vm3_vm0, %v206_v39  }
  0xab   :  { %264 = vst.msk [vmem:[#allocation0 + $0x8c] ss:$16 sm:$0x3] %vm3_vm0, %v261_v34  }
  0xac   :  { %266 = vst.msk [vmem:[#allocation0 + $0x8c] ss:$16 sm:$0xc] %vm3_vm0, %v261_v34   ;;  %v248_v41 = vpop.permute.xlu1 %247   ;;  %v240_v42 = vpop.permute.xlu0 %239  }
  0xad   :  { %251 = vst.msk [vmem:[#allocation0 + $0xc] ss:$16 sm:$0x3] %vm3_vm0, %v248_v41  }
  0xae   :  { %253 = vst.msk [vmem:[#allocation0 + $0xc] ss:$16 sm:$0xc] %vm3_vm0, %v248_v41  }
  0xaf   :  { %255 = vst.msk [vmem:[#allocation0 + $0xc] ss:$16 sm:$0x30] %vm3_vm0, %v248_v41  }
  0xb0   :  { %257 = vst.msk [vmem:[#allocation0 + $0xc] ss:$16 sm:$0xc0] %vm3_vm0, %v248_v41  }
  0xb1   :  { %243 = vst.msk [vmem:[#allocation0 + $0x8b] ss:$16 sm:$0x3] %vm3_vm0, %v240_v42  }
  0xb2   :  { %245 = vst.msk [vmem:[#allocation0 + $0x8b] ss:$16 sm:$0xc] %vm3_vm0, %v240_v42  }
  0xb3   :  { %293 = vst.msk [vmem:[#allocation0 + $0xe] ss:$16 sm:$0x3] %vm3_vm0, %v290_v37  }
  0xb4   :  { %295 = vst.msk [vmem:[#allocation0 + $0xe] ss:$16 sm:$0xc] %vm3_vm0, %v290_v37   ;;  %v282_v43 = vpop.permute.xlu1 %281   ;;  %v269_v44 = vpop.permute.xlu0 %268  }
  0xb5   :  { %297 = vst.msk [vmem:[#allocation0 + $0xe] ss:$16 sm:$0x30] %vm3_vm0, %v290_v37  }
  0xb6   :  { %299 = vst.msk [vmem:[#allocation0 + $0xe] ss:$16 sm:$0xc0] %vm3_vm0, %v290_v37  }
  0xb7   :  { %285 = vst.msk [vmem:[#allocation0 + $0x8d] ss:$16 sm:$0x3] %vm3_vm0, %v282_v43  }
  0xb8   :  { %287 = vst.msk [vmem:[#allocation0 + $0x8d] ss:$16 sm:$0xc] %vm3_vm0, %v282_v43  }
  0xb9   :  { %272 = vst.msk [vmem:[#allocation0 + $0xd] ss:$16 sm:$0x3] %vm3_vm0, %v269_v44  }
  0xba   :  { %274 = vst.msk [vmem:[#allocation0 + $0xd] ss:$16 sm:$0xc] %vm3_vm0, %v269_v44  }
  0xbb   :  { %276 = vst.msk [vmem:[#allocation0 + $0xd] ss:$16 sm:$0x30] %vm3_vm0, %v269_v44  }
  0xbc   :  { %278 = vst.msk [vmem:[#allocation0 + $0xd] ss:$16 sm:$0xc0] %vm3_vm0, %v269_v44   ;;  %v311_v45 = vpop.permute.xlu1 %310   ;;  %v303_v46 = vpop.permute.xlu0 %302  }
  0xbd   :  { %327 = vst.msk [vmem:[#allocation0 + $0x8f] ss:$16 sm:$0x3] %vm3_vm0, %v324_v40  }
  0xbe   :  { %329 = vst.msk [vmem:[#allocation0 + $0x8f] ss:$16 sm:$0xc] %vm3_vm0, %v324_v40  }
  0xbf   :  { %314 = vst.msk [vmem:[#allocation0 + $0xf] ss:$16 sm:$0x3] %vm3_vm0, %v311_v45  }
  0xc0   :  { %316 = vst.msk [vmem:[#allocation0 + $0xf] ss:$16 sm:$0xc] %vm3_vm0, %v311_v45  }
  0xc1   :  { %318 = vst.msk [vmem:[#allocation0 + $0xf] ss:$16 sm:$0x30] %vm3_vm0, %v311_v45  }
  0xc2   :  { %320 = vst.msk [vmem:[#allocation0 + $0xf] ss:$16 sm:$0xc0] %vm3_vm0, %v311_v45  }
  0xc3   :  { %306 = vst.msk [vmem:[#allocation0 + $0x8e] ss:$16 sm:$0x3] %vm3_vm0, %v303_v46  }
  0xc4   :  { %308 = vst.msk [vmem:[#allocation0 + $0x8e] ss:$16 sm:$0xc] %vm3_vm0, %v303_v46  }
  0xc6   :  { %v338_v49 = vld [vmem:[#allocation0 + $0x8] sm:$0xff]  ;;  %v352_v50 = vld [vmem:[#allocation0 + $0x18] sm:$0xff] }
  0xc7   :  { %v540_v52 = vpack.c.bf16 %v338_v49, %v332_v47  ;;  %v545_v53 = vpack.c.bf16 %v352_v50, %v345_v48  ;;  %v366_v54 = vld [vmem:[#allocation0 + $0x28] sm:$0xff]  ;;  %v380_v56 = vld [vmem:[#allocation0 + $0x38] sm:$0xff] }
  0xc8   :  { %v550_v57 = vpack.c.bf16 %v366_v54, %v359_v51  ;;  %v555_v58 = vpack.c.bf16 %v380_v56, %v373_v55  ;;  %v394_v60 = vld [vmem:[#allocation0 + $0x48] sm:$0xff]  ;;  %v408_v61 = vld [vmem:[#allocation0 + $0x58] sm:$0xff] }
  0xc9   :  { %541 = vst [vmem:[%s832_s1] sm:$0xff] %v540_v52   ;;  %v560_v62 = vpack.c.bf16 %v394_v60, %v387_v59  ;;  %v422_v0 = vld [vmem:[#allocation0 + $0x68] sm:$0xff]  ;;  %v436_v1 = vld [vmem:[#allocation0 + $0x78] sm:$0xff]  ;;  %v565_v2 = vpack.c.bf16 %v408_v61, %v401_v63 }
  0xca   :  { %597 = vst [vmem:[%s832_s1 + $0x8] sm:$0xff] %v545_v53   ;;  %v450_v4 = vld [vmem:[#allocation0 + $0x88] sm:$0xff]  ;;  %v570_v5 = vpack.c.bf16 %v422_v0, %v415_v3  ;;  %v464_v7 = vld [vmem:[#allocation0 + $0x98] sm:$0xff]  ;;  %v575_v9 = vpack.c.bf16 %v436_v1, %v429_v6 }
  0xcb   :  { %598 = vst [vmem:[%s832_s1 + $0x10] sm:$0xff] %v550_v57   ;;  %v478_v10 = vld [vmem:[#allocation0 + $0xa8] sm:$0xff]  ;;  %v580_v12 = vpack.c.bf16 %v450_v4, %v443_v8  ;;  %v492_v13 = vld [vmem:[#allocation0 + $0xb8] sm:$0xff]  ;;  %v585_v15 = vpack.c.bf16 %v464_v7, %v457_v11 }
  0xcc   :  { %599 = vst [vmem:[%s832_s1 + $0x18] sm:$0xff] %v555_v58   ;;  %v590_v17 = vpack.c.bf16 %v478_v10, %v471_v14  ;;  %v595_v18 = vpack.c.bf16 %v492_v13, %v485_v16 }
  0xcd   :  { %600 = vst [vmem:[%s832_s1 + $0x20] sm:$0xff] %v560_v62  }
  0xce   :  { %601 = vst [vmem:[%s832_s1 + $0x28] sm:$0xff] %v565_v2  }
  0xcf   :  { %602 = vst [vmem:[%s832_s1 + $0x30] sm:$0xff] %v570_v5  }
  0xd0   :  { %603 = vst [vmem:[%s832_s1 + $0x38] sm:$0xff] %v575_v9  }
  0xd1   :  { %604 = vst [vmem:[%s832_s1 + $0x40] sm:$0xff] %v580_v12  }
  0xd2   :  { %605 = vst [vmem:[%s832_s1 + $0x48] sm:$0xff] %v585_v15  }
  0xd3   :  { %606 = vst [vmem:[%s832_s1 + $0x50] sm:$0xff] %v590_v17  }
  0xd4   :  { %607 = vst [vmem:[%s832_s1 + $0x58] sm:$0xff] %v595_v18  }

// kernel: _lambda_.7
= control target key start
LH: loop header
LB: loop body
LE: loop exit
PB: predicated region body
PF: predicated region fallthrough
CT: control target
= control target key end

     0   :  { %v111_v1 = vmov 0   ;;  %vm58_vm0 = vcmask 392192   ;;  %s159_s1 = inlined_call_operand.vmem [shape: bf16[1,48,128], index: 1, kind: input, shape index: {}]   ;;  %s160_s2 = inlined_call_operand.vmem [shape: f32[12,1], index: 2, kind: input, shape index: {}]   ;;  %s161_s0 = inlined_call_operand.vmem [shape: bf16[1,12,48], index: 0, kind: input, shape index: {}]   ;;  %s162_s3 = inlined_call_operand.vmem [shape: f32[1,12,128], index: 3, kind: output, shape index: {}]  }
   0x1   :  { %v108_v0 = vld [vmem:[%s159_s1 + $0x10] sm:$0xff]  ;;  %110 = vset.pattern.permute.xlu0 %v111_v1  ;;  %v23_v2 = vld [vmem:[%s160_s2] sm:$0xff]  ;;  %v107_v3 = vld [vmem:[%s159_s1 + $0x8] sm:$0xff] }
   0x2   :  { %67 = vmatpush.bf16.msra.mxu0 %v108_v0  ;;  %27 = vperm.xlu0 %110, %v23_v2   ;;  %v106_v4 = vld [vmem:[%s159_s1] sm:$0xff]  ;;  %v24_v7 = vld [vmem:[%s160_s2 + $0x8] sm:$0xf] }
   0x3   :  { %v90_v5 = vld [vmem:[%s161_s0] sm:$0xf]  ;;  %v105_v6 = vld [vmem:[%s161_s0] sm:$0x30] }
   0x4   :  { %v91_v8 = vor.u32 %v105_v6, %v90_v5 }
   0x6   :  { %68 = vmatpush.bf16.msra.mxu0 %v107_v3 }
   0xa   :  { %69 = vmatpush.bf16.msra.mxu0 %v106_v4  ;;  %32 = vperm.xlu0 %110, %v24_v7  }
   0xd   :  { %104 = vmatmul.msk.bf16.vlgmr.msra.gmra.mxu0 %vm58_vm0, %v91_v8 }
  0x74   :  { %v28_v9 = vpop.permute.xlu0 %27 }
  0x7c   :  { %v33_v14 = vpop.permute.xlu0 %32 }
  0x8a   :  { %v71_v10 = vpop.f32.mrf.mxu0 }
  0x8b   :  { %v72_v11 = vadd.f32 %v71_v10, %v28_v9 }
  0x8d   :  { %vm76_vm1 = vcmp.ge.f32.partialorder %v72_v11, 0.0  ;;  %v78_v12 = vmul.f32 0.01, %v72_v11 }
  0x8f   :  { %v80_v13 = vsel %vm76_vm1, %v72_v11, %v78_v12 }
  0x90   :  { %82 = vst [vmem:[%s162_s3] sm:$0xff] %v80_v13 }
  0x92   :  { %v73_v15 = vpop.f32.mrf.mxu0 }
  0x93   :  { %v74_v16 = vadd.f32 %v73_v15, %v33_v14 }
  0x95   :  { %vm77_vm2 = vcmp.ge.f32.partialorder %v74_v16, 0.0  ;;  %v79_v17 = vmul.f32 0.01, %v74_v16 }
  0x97   :  { %v81_v18 = vsel %vm77_vm2, %v74_v16, %v79_v17 }
  0x98   :  { %83 = vst [vmem:[%s162_s3 + $0x8] sm:$0xf] %v81_v18 }

// kernel: _lambda_.8
= control target key start
LH: loop header
LB: loop body
LE: loop exit
PB: predicated region body
PF: predicated region fallthrough
CT: control target
= control target key end

     0   :  { %v290_v4 = vmov 0   ;;  %vm147_vm0 = vcmask 523264   ;;  %vm199_vm2 = vcmask 261120   ;;  %s385_s1 = inlined_call_operand.vmem [shape: bf16[1,192,32], index: 1, kind: input, shape index: {}]   ;;  %s386_s2 = inlined_call_operand.vmem [shape: f32[24,1], index: 2, kind: input, shape index: {}]   ;;  %s387_s0 = inlined_call_operand.vmem [shape: bf16[1,24,192], index: 0, kind: input, shape index: {}]   ;;  %s388_s3 = inlined_call_operand.vmem [shape: f32[1,24,32], index: 3, kind: output, shape index: {}]  }
   0x1   :  { %v274_v0 = vld [vmem:[%s385_s1 + $0x38] sm:$0xff]  ;;  %v273_v2 = vld [vmem:[%s385_s1 + $0x30] sm:$0xff]  ;;  %288 = vset.pattern.permute.xlu0 %v290_v4  ;;  %289 = vset.pattern.permute.xlu1 %v290_v4  ;;  %v42_v5 = vld [vmem:[%s386_s2] sm:$0xff] }
   0x2   :  { %v278_v1 = vld [vmem:[%s385_s1 + $0x58] sm:$0xff]  ;;  %154 = vmatpush.bf16.msra.mxu0 %v274_v0  ;;  %279 = vmatpush.bf16.msra.mxu2 %v274_v0  ;;  %v277_v3 = vld [vmem:[%s385_s1 + $0x50] sm:$0xff]  ;;  %v272_v6 = vld [vmem:[%s385_s1 + $0x28] sm:$0xff] }
   0x3   :  { %176 = vmatpush.bf16.msra.mxu1 %v278_v1  ;;  %v44_v7 = vld [vmem:[%s386_s2 + $0x10] sm:$0xff]  ;;  %v276_v8 = vld [vmem:[%s385_s1 + $0x48] sm:$0xff]  ;;  %47 = vperm.xlu0 %288, %v42_v5   ;;  %v271_v9 = vld [vmem:[%s385_s1 + $0x20] sm:$0xff] }
   0x4   :  { %57 = vperm.xlu1 %289, %v44_v7   ;;  %v275_v10 = vld [vmem:[%s385_s1 + $0x40] sm:$0xff]  ;;  %v211_v12 = vld [vmem:[%s387_s0 + $0x8] sm:$0xf0]  ;;  %v270_v15 = vld [vmem:[%s385_s1 + $0x18] sm:$0xff] }
   0x5   :  { %v265_v11 = vld [vmem:[%s387_s0 + $0x4] sm:$0xf]  ;;  %v43_v13 = vld [vmem:[%s386_s2 + $0x8] sm:$0xff]  ;;  %v269_v16 = vld [vmem:[%s385_s1 + $0x10] sm:$0xff] }
   0x6   :  { %155 = vmatpush.bf16.msra.mxu0 %v273_v2  ;;  %280 = vmatpush.bf16.msra.mxu2 %v273_v2  ;;  %v214_v14 = vor.u32 %v265_v11, %v211_v12  ;;  %v268_v17 = vld [vmem:[%s385_s1 + $0x8] sm:$0xff]  ;;  %v17_v18 = vld [vmem:[%s387_s0 + $0x10] sm:$0xff]  ;;  %v267_v19 = vld [vmem:[%s385_s1] sm:$0xff] }
   0x7   :  { %177 = vmatpush.bf16.msra.mxu1 %v277_v3  ;;  %v209_v20 = vld [vmem:[%s387_s0] sm:$0xf]  ;;  %v266_v21 = vld [vmem:[%s387_s0 + $0x4] sm:$0xf0]  ;;  %v67_v22 = vunpack.c.l.b16 %v17_v18  ;;  %v68_v23 = vunpack.c.h.b16 %v17_v18 }
   0x8   :  { %v210_v24 = vor.u32 %v266_v21, %v209_v20 }
   0x9   :  { %v71_v25 = vpack.c.b16 %v67_v22, %v67_v22  ;;  %v72_v26 = vpack.c.b16 %v68_v23, %v68_v23 }
   0xa   :  { %156 = vmatpush.bf16.msra.mxu0 %v272_v6  ;;  %281 = vmatpush.bf16.msra.mxu2 %v272_v6 }
   0xb   :  { %178 = vmatpush.bf16.msra.mxu1 %v276_v8  ;;  %52 = vperm.xlu0 %288, %v43_v13  }
   0xe   :  { %157 = vmatpush.bf16.msra.mxu0 %v271_v9  ;;  %282 = vmatpush.bf16.msra.mxu2 %v271_v9 }
   0xf   :  { %179 = vmatpush.bf16.msra.mxu1 %v275_v10 }
  0x12   :  { %263 = vmatmul.msk.bf16.vlgmr.msra.gmra.mxu1 %vm147_vm0, %v214_v14  ;;  %158 = vmatpush.bf16.msra.mxu0 %v270_v15 }
  0x13   :  { %283 = vmatpush.bf16.msra.mxu2 %v270_v15 }
  0x16   :  { %159 = vmatpush.bf16.msra.mxu0 %v269_v16 }
  0x17   :  { %284 = vmatpush.bf16.msra.mxu2 %v269_v16 }
  0x1a   :  { %160 = vmatpush.bf16.msra.mxu0 %v268_v17 }
  0x1b   :  { %285 = vmatpush.bf16.msra.mxu2 %v268_v17 }
  0x1e   :  { %161 = vmatpush.bf16.msra.mxu0 %v267_v19 }
  0x1f   :  { %286 = vmatpush.bf16.msra.mxu2 %v267_v19 }
  0x21   :  { %162 = vmatmul.bf16.vlgmr.msra.gmra.mxu0 %v210_v24 }
  0x22   :  { %167 = vmatmul.bf16.vlgmr.msra.gmra.mxu2 %v71_v25  ;;  %264 = vmatmul.msk.bf16.gmra.mxu1 %vm147_vm0, %v72_v26 }
  0x75   :  { %v48_v29 = vpop.permute.xlu0 %47 }
  0x76   :  { %v58_v35 = vpop.permute.xlu1 %57 }
  0x7d   :  { %v53_v38 = vpop.permute.xlu0 %52 }
  0x8f   :  { %v181_v27 = vpop.f32.mrf.mxu1 }
  0x97   :  { %v183_v28 = vpop.f32.mrf.mxu1 }
  0x9e   :  { %v163_v30 = vpop.f32.mrf.mxu0 }
  0x9f   :  { %v164_v31 = vadd.f32 %v163_v30, %v48_v29  ;;  %v186_v32 = vpop.f32.mrf.mxu1 }
  0xa1   :  { %v182_v33 = vadd.f32 %v181_v27, %v164_v31 }
  0xa3   :  { %vm190_vm1 = vcmp.ge.f32.partialorder %v182_v33, 0.0  ;;  %v193_v34 = vmul.f32 0.01, %v182_v33 }
  0xa5   :  { %v196_v36 = vsel %vm190_vm1, %v182_v33, %v193_v34  ;;  %v168_v37 = vpop.f32.mrf.mxu2 }
  0xa6   :  { %200 = vst.msk [vmem:[%s388_s3] sm:$0xff] %vm199_vm2, %v196_v36  ;;  %v169_v39 = vadd.f32 %v168_v37, %v58_v35  ;;  %v165_v40 = vpop.f32.mrf.mxu0 }
  0xa7   :  { %v166_v41 = vadd.f32 %v165_v40, %v53_v38  ;;  %v188_v42 = vpop.f32.mrf.mxu1 }
  0xa8   :  { %v187_v43 = vadd.f32 %v186_v32, %v169_v39 }
  0xa9   :  { %v184_v44 = vadd.f32 %v183_v28, %v166_v41 }
  0xaa   :  { %vm192_vm3 = vcmp.ge.f32.partialorder %v187_v43, 0.0  ;;  %v195_v45 = vmul.f32 0.01, %v187_v43 }
  0xab   :  { %vm191_vm4 = vcmp.ge.f32.partialorder %v184_v44, 0.0  ;;  %v194_v46 = vmul.f32 0.01, %v184_v44 }
  0xac   :  { %v198_v47 = vsel %vm192_vm3, %v187_v43, %v195_v45 }
  0xad   :  { %202 = vst.msk [vmem:[%s388_s3 + $0x10] sm:$0xff] %vm199_vm2, %v198_v47  ;;  %v197_v48 = vsel %vm191_vm4, %v184_v44, %v194_v46  ;;  %v170_v49 = vpop.f32.mrf.mxu2 }
  0xae   :  { %201 = vst.msk [vmem:[%s388_s3 + $0x8] sm:$0xff] %vm199_vm2, %v197_v48 }

// kernel: _lambda_.9
= control target key start
LH: loop header
LB: loop body
LE: loop exit
PB: predicated region body
PF: predicated region fallthrough
CT: control target
= control target key end

     0   :  { %v580_v6 = vmov 0   ;;  %vm392_vm1 = vcmask 64512   ;;  %s769_s1 = inlined_call_operand.vmem [shape: bf16[1,384,8], index: 1, kind: input, shape index: {}]   ;;  %s770_s2 = inlined_call_operand.vmem [shape: f32[48,1], index: 2, kind: input, shape index: {}]   ;;  %s771_s0 = inlined_call_operand.vmem [shape: bf16[1,48,384], index: 0, kind: input, shape index: {}]   ;;  %s772_s3 = inlined_call_operand.vmem [shape: f32[1,48,8], index: 3, kind: output, shape index: {}]  }
   0x1   :  { %v551_v0 = vld [vmem:[%s769_s1 + $0x38] sm:$0xff]  ;;  %v550_v3 = vld [vmem:[%s769_s1 + $0x30] sm:$0xff]  ;;  %577 = vset.pattern.permute.xlu0 %v580_v6  ;;  %578 = vset.pattern.permute.xlu1 %v580_v6  ;;  %v549_v7 = vld [vmem:[%s769_s1 + $0x28] sm:$0xff] }
   0x2   :  { %v559_v1 = vld [vmem:[%s769_s1 + $0x78] sm:$0xff]  ;;  %302 = vmatpush.bf16.msra.mxu0 %v551_v0  ;;  %v558_v4 = vld [vmem:[%s769_s1 + $0x70] sm:$0xff]  ;;  %568 = vmatpush.bf16.msra.mxu3 %v551_v0  ;;  %v557_v8 = vld [vmem:[%s769_s1 + $0x68] sm:$0xff] }
   0x3   :  { %v567_v2 = vld [vmem:[%s769_s1 + $0xb8] sm:$0xff]  ;;  %326 = vmatpush.bf16.msra.mxu1 %v559_v1  ;;  %v566_v5 = vld [vmem:[%s769_s1 + $0xb0] sm:$0xff]  ;;  %579 = vset.pattern.permute.xlu2 %v580_v6  ;;  %v565_v9 = vld [vmem:[%s769_s1 + $0xa8] sm:$0xff] }
   0x4   :  { %350 = vmatpush.bf16.msra.mxu2 %v567_v2  ;;  %v548_v10 = vld [vmem:[%s769_s1 + $0x20] sm:$0xff]  ;;  %v547_v14 = vld [vmem:[%s769_s1 + $0x18] sm:$0xff]  ;;  %v546_v17 = vld [vmem:[%s769_s1 + $0x10] sm:$0xff] }
   0x5   :  { %v556_v11 = vld [vmem:[%s769_s1 + $0x60] sm:$0xff]  ;;  %v555_v15 = vld [vmem:[%s769_s1 + $0x58] sm:$0xff]  ;;  %v554_v18 = vld [vmem:[%s769_s1 + $0x50] sm:$0xff] }
   0x6   :  { %303 = vmatpush.bf16.msra.mxu0 %v550_v3  ;;  %569 = vmatpush.bf16.msra.mxu3 %v550_v3  ;;  %v74_v12 = vld [vmem:[%s770_s2] sm:$0xff]  ;;  %v563_v16 = vld [vmem:[%s769_s1 + $0x98] sm:$0xff]  ;;  %v75_v19 = vld [vmem:[%s770_s2 + $0x8] sm:$0xff] }
   0x7   :  { %327 = vmatpush.bf16.msra.mxu1 %v558_v4  ;;  %v564_v13 = vld [vmem:[%s769_s1 + $0xa0] sm:$0xff]  ;;  %82 = vperm.xlu0 %577, %v74_v12   ;;  %v562_v20 = vld [vmem:[%s769_s1 + $0x90] sm:$0xff]  ;;  %v545_v22 = vld [vmem:[%s769_s1 + $0x8] sm:$0xff] }
   0x8   :  { %351 = vmatpush.bf16.msra.mxu2 %v566_v5  ;;  %v76_v21 = vld [vmem:[%s770_s2 + $0x10] sm:$0xff]  ;;  %v553_v23 = vld [vmem:[%s769_s1 + $0x48] sm:$0xff]  ;;  %v544_v25 = vld [vmem:[%s769_s1] sm:$0xff] }
   0x9   :  { %92 = vperm.xlu1 %578, %v76_v21   ;;  %v561_v24 = vld [vmem:[%s769_s1 + $0x88] sm:$0xff]  ;;  %v552_v26 = vld [vmem:[%s769_s1 + $0x40] sm:$0xff]  ;;  %v77_v30 = vld [vmem:[%s770_s2 + $0x18] sm:$0xff] }
   0xa   :  { %304 = vmatpush.bf16.msra.mxu0 %v549_v7  ;;  %570 = vmatpush.bf16.msra.mxu3 %v549_v7  ;;  %v560_v27 = vld [vmem:[%s769_s1 + $0x80] sm:$0xff]  ;;  %v536_v29 = vld [vmem:[%s771_s0 + $0x8] sm:$0xf0]  ;;  %v407_v32 = vld [vmem:[%s771_s0 + $0xc] sm:$0xf0] }
   0xb   :  { %328 = vmatpush.bf16.msra.mxu1 %v557_v8  ;;  %v405_v28 = vld [vmem:[%s771_s0] sm:$0xf]  ;;  %v535_v31 = vld [vmem:[%s771_s0 + $0x4] sm:$0xf]  ;;  %v413_v33 = vld [vmem:[%s771_s0 + $0x8] sm:$0xf] }
   0xc   :  { %352 = vmatpush.bf16.msra.mxu2 %v565_v9  ;;  %v537_v34 = vld [vmem:[%s771_s0 + $0x10] sm:$0xf0]  ;;  %v417_v35 = vld [vmem:[%s771_s0 + $0x18] sm:$0xf]  ;;  %v539_v36 = vld [vmem:[%s771_s0 + $0x20] sm:$0xf0]  ;;  %v406_v37 = vor.u32 %v536_v29, %v405_v28  ;;  %v410_v38 = vor.u32 %v535_v31, %v407_v32 }
   0xd   :  { %v414_v39 = vor.u32 %v537_v34, %v413_v33  ;;  %v418_v40 = vor.u32 %v539_v36, %v417_v35  ;;  %v78_v41 = vld [vmem:[%s770_s2 + $0x20] sm:$0xff]  ;;  %v79_v42 = vld [vmem:[%s770_s2 + $0x28] sm:$0xff]  ;;  %v538_v43 = vld [vmem:[%s771_s0 + $0x1c] sm:$0xf] }
   0xe   :  { %305 = vmatpush.bf16.msra.mxu0 %v548_v10  ;;  %571 = vmatpush.bf16.msra.mxu3 %v548_v10  ;;  %v419_v44 = vld [vmem:[%s771_s0 + $0x24] sm:$0xf0]  ;;  %v425_v45 = vld [vmem:[%s771_s0 + $0x20] sm:$0xf]  ;;  %v540_v46 = vld [vmem:[%s771_s0 + $0x28] sm:$0xf0] }
   0xf   :  { %329 = vmatpush.bf16.msra.mxu1 %v556_v11  ;;  %87 = vperm.xlu0 %577, %v75_v19   ;;  %v429_v47 = vld [vmem:[%s771_s0 + $0x30] sm:$0xf]  ;;  %v542_v48 = vld [vmem:[%s771_s0 + $0x38] sm:$0xf0]  ;;  %v422_v49 = vor.u32 %v538_v43, %v419_v44  ;;  %v426_v50 = vor.u32 %v540_v46, %v425_v45  ;;  %v541_v52 = vld [vmem:[%s771_s0 + $0x34] sm:$0xf] }
  0x10   :  { %353 = vmatpush.bf16.msra.mxu2 %v564_v13  ;;  %102 = vperm.xlu2 %579, %v78_v41   ;;  %v430_v51 = vor.u32 %v542_v48, %v429_v47  ;;  %v431_v53 = vld [vmem:[%s771_s0 + $0x3c] sm:$0xf0]  ;;  %v437_v54 = vld [vmem:[%s771_s0 + $0x38] sm:$0xf]  ;;  %v543_v55 = vld [vmem:[%s771_s0 + $0x40] sm:$0xf0] }
  0x11   :  { %97 = vperm.xlu1 %578, %v77_v30   ;;  %v434_v56 = vor.u32 %v541_v52, %v431_v53  ;;  %v438_v57 = vor.u32 %v543_v55, %v437_v54 }
  0x12   :  { %306 = vmatpush.bf16.msra.mxu0 %v547_v14  ;;  %572 = vmatpush.bf16.msra.mxu3 %v547_v14 }
  0x13   :  { %330 = vmatpush.bf16.msra.mxu1 %v555_v15 }
  0x14   :  { %354 = vmatpush.bf16.msra.mxu2 %v563_v16 }
  0x16   :  { %307 = vmatpush.bf16.msra.mxu0 %v546_v17  ;;  %573 = vmatpush.bf16.msra.mxu3 %v546_v17 }
  0x17   :  { %331 = vmatpush.bf16.msra.mxu1 %v554_v18 }
  0x18   :  { %355 = vmatpush.bf16.msra.mxu2 %v562_v20  ;;  %107 = vperm.xlu2 %579, %v79_v42  }
  0x1a   :  { %308 = vmatpush.bf16.msra.mxu0 %v545_v22  ;;  %574 = vmatpush.bf16.msra.mxu3 %v545_v22 }
  0x1b   :  { %332 = vmatpush.bf16.msra.mxu1 %v553_v23 }
  0x1c   :  { %356 = vmatpush.bf16.msra.mxu2 %v561_v24 }
  0x1e   :  { %309 = vmatpush.bf16.msra.mxu0 %v544_v25  ;;  %575 = vmatpush.bf16.msra.mxu3 %v544_v25 }
  0x1f   :  { %333 = vmatpush.bf16.msra.mxu1 %v552_v26 }
  0x20   :  { %357 = vmatpush.bf16.msra.mxu2 %v560_v27 }
  0x21   :  { %310 = vmatmul.bf16.vlgmr.msra.gmra.mxu0 %v406_v37  ;;  %315 = vmatmul.bf16.vlgmr.msra.gmra.mxu3 %v418_v40 }
  0x22   :  { %334 = vmatmul.bf16.vlgmr.msra.gmra.mxu1 %v410_v38 }
  0x23   :  { %358 = vmatmul.bf16.vlgmr.msra.gmra.mxu2 %v414_v39 }
  0x31   :  { %320 = vmatmul.bf16.gmra.mxu3 %v430_v51 }
  0x32   :  { %339 = vmatmul.bf16.gmra.mxu1 %v422_v49 }
  0x33   :  { %363 = vmatmul.bf16.gmra.mxu2 %v426_v50 }
  0x42   :  { %344 = vmatmul.bf16.gmra.mxu1 %v434_v56 }
  0x43   :  { %368 = vmatmul.bf16.gmra.mxu2 %v438_v57 }
  0x6a   :  { %v103_v26 = vpop.permute.xlu2 %102 }
  0x72   :  { %v108_v37 = vpop.permute.xlu2 %107 }
  0x79   :  { %v83_v58 = vpop.permute.xlu0 %82 }
  0x7b   :  { %v93_v9 = vpop.permute.xlu1 %92 }
  0x81   :  { %v88_v0 = vpop.permute.xlu0 %87 }
  0x83   :  { %v98_v21 = vpop.permute.xlu1 %97 }
  0x9e   :  { %v311_v59 = vpop.f32.mrf.mxu0 }
  0x9f   :  { %v335_v60 = vpop.f32.mrf.mxu1  ;;  %v312_v61 = vadd.f32 %v311_v59, %v83_v58 }
  0xa1   :  { %v336_v62 = vadd.f32 %v335_v60, %v312_v61 }
  0xa4   :  { %v316_v6 = vpop.f32.mrf.mxu3 }
  0xa5   :  { %v317_v11 = vadd.f32 %v316_v6, %v93_v9 }
  0xa6   :  { %v359_v63 = vpop.f32.mrf.mxu2  ;;  %v313_v2 = vpop.f32.mrf.mxu0 }
  0xa7   :  { %v360_v1 = vadd.f32 %v359_v63, %v336_v62  ;;  %v337_v3 = vpop.f32.mrf.mxu1  ;;  %v314_v5 = vadd.f32 %v313_v2, %v88_v0 }
  0xa9   :  { %vm374_vm0 = vcmp.ge.f32.partialorder %v360_v1, 0.0  ;;  %v380_v4 = vmul.f32 0.01, %v360_v1  ;;  %v338_v8 = vadd.f32 %v337_v3, %v314_v5 }
  0xab   :  { %v386_v7 = vsel %vm374_vm0, %v360_v1, %v380_v4 }
  0xac   :  { %393 = vst.msk [vmem:[%s772_s3] sm:$0xff] %vm392_vm1, %v386_v7  ;;  %v318_v17 = vpop.f32.mrf.mxu3 }
  0xad   :  { %v319_v23 = vadd.f32 %v318_v17, %v98_v21 }
  0xae   :  { %v361_v10 = vpop.f32.mrf.mxu2 }
  0xaf   :  { %v362_v12 = vadd.f32 %v361_v10, %v338_v8  ;;  %v340_v13 = vpop.f32.mrf.mxu1 }
  0xb0   :  { %v341_v16 = vadd.f32 %v340_v13, %v317_v11 }
  0xb1   :  { %vm375_vm2 = vcmp.ge.f32.partialorder %v362_v12, 0.0  ;;  %v381_v14 = vmul.f32 0.01, %v362_v12 }
  0xb3   :  { %v387_v15 = vsel %vm375_vm2, %v362_v12, %v381_v14 }
  0xb4   :  { %394 = vst.msk [vmem:[%s772_s3 + $0x8] sm:$0xff] %vm392_vm1, %v387_v15  ;;  %v321_v27 = vpop.f32.mrf.mxu3 }
  0xb5   :  { %v322_v29 = vadd.f32 %v321_v27, %v103_v26 }
  0xb6   :  { %v364_v18 = vpop.f32.mrf.mxu2 }
  0xb7   :  { %v365_v19 = vadd.f32 %v364_v18, %v341_v16  ;;  %v342_v20 = vpop.f32.mrf.mxu1 }
  0xb8   :  { %v343_v25 = vadd.f32 %v342_v20, %v319_v23 }
  0xb9   :  { %vm376_vm3 = vcmp.ge.f32.partialorder %v365_v19, 0.0  ;;  %v382_v22 = vmul.f32 0.01, %v365_v19 }
  0xbb   :  { %v388_v24 = vsel %vm376_vm3, %v365_v19, %v382_v22 }
  0xbc   :  { %395 = vst.msk [vmem:[%s772_s3 + $0x10] sm:$0xff] %vm392_vm1, %v388_v24  ;;  %v323_v38 = vpop.f32.mrf.mxu3 }
  0xbd   :  { %v324_v41 = vadd.f32 %v323_v38, %v108_v37 }
  0xbe   :  { %v366_v28 = vpop.f32.mrf.mxu2 }
  0xbf   :  { %v367_v30 = vadd.f32 %v366_v28, %v343_v25  ;;  %v345_v31 = vpop.f32.mrf.mxu1 }
  0xc0   :  { %v346_v34 = vadd.f32 %v345_v31, %v322_v29 }
  0xc1   :  { %vm377_vm4 = vcmp.ge.f32.partialorder %v367_v30, 0.0  ;;  %v383_v32 = vmul.f32 0.01, %v367_v30 }
  0xc3   :  { %v389_v33 = vsel %vm377_vm4, %v367_v30, %v383_v32 }
  0xc4   :  { %396 = vst.msk [vmem:[%s772_s3 + $0x18] sm:$0xff] %vm392_vm1, %v389_v33 }
  0xc6   :  { %v369_v35 = vpop.f32.mrf.mxu2 }
  0xc7   :  { %v370_v36 = vadd.f32 %v369_v35, %v346_v34  ;;  %v347_v40 = vpop.f32.mrf.mxu1 }
  0xc8   :  { %v348_v43 = vadd.f32 %v347_v40, %v324_v41 }
  0xc9   :  { %vm378_vm5 = vcmp.ge.f32.partialorder %v370_v36, 0.0  ;;  %v384_v39 = vmul.f32 0.01, %v370_v36 }
  0xcb   :  { %v390_v42 = vsel %vm378_vm5, %v370_v36, %v384_v39 }
  0xcc   :  { %397 = vst.msk [vmem:[%s772_s3 + $0x20] sm:$0xff] %vm392_vm1, %v390_v42 }
  0xce   :  { %v371_v44 = vpop.f32.mrf.mxu2 }
  0xcf   :  { %v372_v45 = vadd.f32 %v371_v44, %v348_v43 }
  0xd1   :  { %vm379_vm6 = vcmp.ge.f32.partialorder %v372_v45, 0.0  ;;  %v385_v46 = vmul.f32 0.01, %v372_v45 }
  0xd3   :  { %v391_v47 = vsel %vm379_vm6, %v372_v45, %v385_v46 }
  0xd4   :  { %398 = vst.msk [vmem:[%s772_s3 + $0x28] sm:$0xff] %vm392_vm1, %v391_v47 }

// kernel: _lambda_.10
= control target key start
LH: loop header
LB: loop body
LE: loop exit
PB: predicated region body
PF: predicated region fallthrough
CT: control target
= control target key end

     0   :  { %vm127_vm0 = vcmask 523264   ;;  %vm187_vm1 = vcmask 261120   ;;  %vm220_vm2 = vcmask 1041408   ;;  %vm223_vm3 = vcmask 519170   ;;  %s416_s1 = inlined_call_operand.vmem [shape: bf16[192,32], index: 1, kind: input, shape index: {}]   ;;  %s417_s0 = inlined_call_operand.vmem [shape: bf16[2,192], index: 0, kind: input, shape index: {}]   ;;  %s418_s2 = inlined_call_operand.vmem [shape: f32[1,32], index: 2, kind: input, shape index: {}]   ;;  %s419_s3 = inlined_call_operand.vmem [shape: bf16[32,192], index: 3, kind: input, shape index: {}]   ;;  %s420_s4 = inlined_call_operand.vmem [shape: f32[1,192], index: 4, kind: input, shape index: {}]   ;;  %s421_s5 = inlined_call_operand.vmem [shape: f32[2,192], index: 5, kind: output, shape index: {}]  }
   0x1   :  { %v304_v0 = vld [vmem:[%s416_s1 + $0x38] sm:$0xff]  ;;  %v303_v2 = vld [vmem:[%s416_s1 + $0x30] sm:$0xff]  ;;  %v21_v4 = vld [vmem:[%s417_s0] sm:$0x3] }
   0x2   :  { %v308_v1 = vld [vmem:[%s416_s1 + $0x58] sm:$0xff]  ;;  %130 = vmatpush.bf16.msra.mxu0 %v304_v0  ;;  %v307_v3 = vld [vmem:[%s416_s1 + $0x50] sm:$0xff]  ;;  %51 = vst [vmem:[#allocation1] ss:$9 sm:$0xff] %v21_v4  ;;  %v302_v5 = vld [vmem:[%s416_s1 + $0x28] sm:$0xff] }
   0x3   :  { %147 = vmatpush.bf16.msra.mxu1 %v308_v1  ;;  %v306_v6 = vld [vmem:[%s416_s1 + $0x48] sm:$0xff]  ;;  %v301_v7 = vld [vmem:[%s416_s1 + $0x20] sm:$0xff]  ;;  %v300_v9 = vld [vmem:[%s416_s1 + $0x18] sm:$0xff] }
   0x4   :  { %v305_v8 = vld [vmem:[%s416_s1 + $0x40] sm:$0xff]  ;;  %v299_v11 = vld [vmem:[%s416_s1 + $0x10] sm:$0xff]  ;;  %v298_v12 = vld [vmem:[%s416_s1 + $0x8] sm:$0xff] }
   0x5   :  { %v297_v13 = vld [vmem:[%s416_s1] sm:$0xff]  ;;  %v289_v15 = vld [vmem:[%s419_s3 + $0x10] sm:$0xf]  ;;  %v312_v16 = vld [vmem:[%s419_s3 + $0x14] sm:$0xf0] }
   0x6   :  { %131 = vmatpush.bf16.msra.mxu0 %v303_v2  ;;  %v311_v17 = vld [vmem:[%s419_s3 + $0x14] sm:$0xf]  ;;  %v290_v18 = vor.u32 %v312_v16, %v289_v15  ;;  %v291_v19 = vld [vmem:[%s419_s3 + $0x18] sm:$0xf0]  ;;  %v281_v21 = vld [vmem:[%s419_s3] sm:$0xf] }
   0x7   :  { %148 = vmatpush.bf16.msra.mxu1 %v307_v3  ;;  %v294_v20 = vor.u32 %v311_v17, %v291_v19  ;;  %v310_v22 = vld [vmem:[%s419_s3 + $0x4] sm:$0xf0]  ;;  %v309_v23 = vld [vmem:[%s419_s3 + $0x4] sm:$0xf]  ;;  %v283_v25 = vld [vmem:[%s419_s3 + $0x8] sm:$0xf0] }
   0x8   :  { %197 = vmatpush.bf16.msra.mxu2 %v290_v18  ;;  %v282_v24 = vor.u32 %v310_v22, %v281_v21  ;;  %v286_v26 = vor.u32 %v309_v23, %v283_v25  ;;  %v313_v29 = vld [vmem:[%s418_s2] ss:$0 sm:$0xff]  ;;  %vm224_vm4 = vmor %vm223_vm3, %vm220_vm2 }
   0x9   :  { %v53_v10 = vld [vmem:[#allocation1 + $0x9] sm:$0xff]  ;;  %v52_v14 = vld [vmem:[#allocation1] sm:$0xff]  ;;  %210 = vmatpush.bf16.msra.mxu3 %v294_v20 }
   0xa   :  { %132 = vmatpush.bf16.msra.mxu0 %v302_v5  ;;  %v161_v35 = vld [vmem:[%s420_s4] sm:$0x3] }
   0xb   :  { %149 = vmatpush.bf16.msra.mxu1 %v306_v6  ;;  %v164_v36 = vperm.slane %v161_v35, 1  ;;  %v163_v37 = vperm.slane %v161_v35, 0 }
   0xc   :  { %198 = vmatpush.bf16.msra.mxu2 %v282_v24 }
   0xd   :  { %211 = vmatpush.bf16.msra.mxu3 %v286_v26 }
   0xe   :  { %133 = vmatpush.bf16.msra.mxu0 %v301_v7 }
   0xf   :  { %150 = vmatpush.bf16.msra.mxu1 %v305_v8 }
  0x12   :  { %134 = vmatpush.bf16.msra.mxu0 %v300_v9  ;;  %278 = vmatmul.msk.bf16.vlgmr.msra.gmra.mxu1 %vm127_vm0, %v53_v10 }
  0x16   :  { %135 = vmatpush.bf16.msra.mxu0 %v299_v11 }
  0x1a   :  { %136 = vmatpush.bf16.msra.mxu0 %v298_v12 }
  0x1e   :  { %137 = vmatpush.bf16.msra.mxu0 %v297_v13 }
  0x21   :  { %138 = vmatmul.bf16.vlgmr.msra.gmra.mxu0 %v52_v14 }
  0x8f   :  { %v152_v27 = vpop.f32.mrf.mxu1 }
  0x97   :  { %v154_v28 = vpop.f32.mrf.mxu1 }
  0x9e   :  { %v139_v30 = vpop.f32.mrf.mxu0 }
  0x9f   :  { %v140_v31 = vadd.f32 %v313_v29, %v139_v30 }
  0xa1   :  { %v153_v32 = vadd.f32 %v152_v27, %v140_v31 }
  0xa3   :  { %v156_v33 = vpack.c.bf16 %v153_v32, %v153_v32 }
  0xa5   :  { %295 = vmatmul.msk.bf16.vlgmr.msra.gmra.mxu2 %vm187_vm1, %v156_v33  ;;  %296 = vmatmul.msk.bf16.vlgmr.msra.gmra.mxu3 %vm187_vm1, %v156_v33 }
  0xa6   :  { %v141_v34 = vpop.f32.mrf.mxu0 }
 0x128   :  { %v200_v38 = vpop.f32.mrf.mxu2  ;;  %v213_v39 = vpop.f32.mrf.mxu3 }
 0x129   :  { %v214_v40 = vadd.f32 %v213_v39, %v164_v36  ;;  %v201_v41 = vadd.f32 %v200_v38, %v163_v37 }
 0x12b   :  { %v219_v42 = vrot.slane %v214_v40, 6 }
 0x12d   :  { %v221_v43 = vsel %vm220_vm2, %v201_v41, %v219_v42 }
 0x12e   :  { %225 = vst.msk [vmem:[%s421_s5] sm:$0xf] %vm224_vm4, %v221_v43 }
 0x130   :  { %v202_v44 = vpop.f32.mrf.mxu2  ;;  %v215_v45 = vpop.f32.mrf.mxu3 }

// kernel: _lambda_.11
= control target key start
LH: loop header
LB: loop body
LE: loop exit
PB: predicated region body
PF: predicated region fallthrough
CT: control target
= control target key end

     0   :  { %v1156_v8 = vmov 0   ;;  %vm147_vm0 = vcmask 523264   ;;  %vm199_vm2 = vcmask 64512   ;;  %s1472_s1 = inlined_call_operand.vmem [shape: bf16[4,192,8], index: 1, kind: input, shape index: {}]   ;;  %s1473_s0 = inlined_call_operand.vmem [shape: bf16[4,24,192], index: 0, kind: input, shape index: {}]   ;;  %s1474_s2 = inlined_call_operand.vmem [shape: f32[24,1], index: 2, kind: input, shape index: {}]   ;;  %s1475_s3 = inlined_call_operand.vmem [shape: f32[4,24,8], index: 3, kind: output, shape index: {}]  }
   0x1   :  { %v1105_v0 = vld [vmem:[%s1472_s1 + $0x38] sm:$0xff]  ;;  %v1104_v4 = vld [vmem:[%s1472_s1 + $0x30] sm:$0xff]  ;;  %1154 = vset.pattern.permute.xlu1 %v1156_v8  ;;  %1153 = vset.pattern.permute.xlu0 %v1156_v8  ;;  %v1103_v9 = vld [vmem:[%s1472_s1 + $0x28] sm:$0xff] }
   0x2   :  { %v1109_v1 = vld [vmem:[%s1472_s1 + $0x58] sm:$0xff]  ;;  %154 = vmatpush.bf16.msra.mxu0 %v1105_v0  ;;  %v1108_v5 = vld [vmem:[%s1472_s1 + $0x50] sm:$0xff]  ;;  %v1107_v10 = vld [vmem:[%s1472_s1 + $0x48] sm:$0xff]  ;;  %1155 = vset.pattern.permute.xlu2 %v1156_v8 }
   0x3   :  { %v1119_v2 = vld [vmem:[%s1472_s1 + $0x98] sm:$0xff]  ;;  %176 = vmatpush.bf16.msra.mxu1 %v1109_v1  ;;  %v1118_v6 = vld [vmem:[%s1472_s1 + $0x90] sm:$0xff]  ;;  %v1117_v11 = vld [vmem:[%s1472_s1 + $0x88] sm:$0xff] }
   0x4   :  { %v1123_v3 = vld [vmem:[%s1472_s1 + $0xb8] sm:$0xff]  ;;  %343 = vmatpush.bf16.msra.mxu2 %v1119_v2  ;;  %v1122_v7 = vld [vmem:[%s1472_s1 + $0xb0] sm:$0xff]  ;;  %v1121_v12 = vld [vmem:[%s1472_s1 + $0xa8] sm:$0xff] }
   0x5   :  { %365 = vmatpush.bf16.msra.mxu3 %v1123_v3  ;;  %v1102_v13 = vld [vmem:[%s1472_s1 + $0x20] sm:$0xff]  ;;  %v778_v17 = vld [vmem:[%s1473_s0 + $0x8] sm:$0xf0]  ;;  %v1110_v19 = vld [vmem:[%s1473_s0 + $0x1c] sm:$0xf] }
   0x6   :  { %155 = vmatpush.bf16.msra.mxu0 %v1104_v4  ;;  %v1106_v14 = vld [vmem:[%s1472_s1 + $0x40] sm:$0xff]  ;;  %v1133_v21 = vld [vmem:[%s1472_s1 + $0xf8] sm:$0xff]  ;;  %v1252_v27 = vld [vmem:[%s1474_s2 + $0x10] sm:$0xff] }
   0x7   :  { %177 = vmatpush.bf16.msra.mxu1 %v1108_v5  ;;  %v1116_v15 = vld [vmem:[%s1472_s1 + $0x80] sm:$0xff]  ;;  %v1137_v22 = vld [vmem:[%s1472_s1 + $0x118] sm:$0xff]  ;;  %v1132_v28 = vld [vmem:[%s1472_s1 + $0xf0] sm:$0xff]  ;;  %57 = vperm.xlu1 %1154, %v1252_v27  }
   0x8   :  { %344 = vmatpush.bf16.msra.mxu2 %v1118_v6  ;;  %v1096_v16 = vld [vmem:[%s1473_s0 + $0x4] sm:$0xf]  ;;  %v1101_v25 = vld [vmem:[%s1472_s1 + $0x18] sm:$0xff]  ;;  %v1136_v29 = vld [vmem:[%s1472_s1 + $0x110] sm:$0xff] }
   0x9   :  { %366 = vmatpush.bf16.msra.mxu3 %v1122_v7  ;;  %v1120_v18 = vld [vmem:[%s1472_s1 + $0xa0] sm:$0xff]  ;;  %v781_v23 = vor.u32 %v1096_v16, %v778_v17  ;;  %v1115_v26 = vld [vmem:[%s1472_s1 + $0x78] sm:$0xff]  ;;  %v1100_v31 = vld [vmem:[%s1472_s1 + $0x10] sm:$0xff] }
   0xa   :  { %156 = vmatpush.bf16.msra.mxu0 %v1103_v9  ;;  %v863_v20 = vld [vmem:[%s1473_s0 + $0x20] sm:$0xf0]  ;;  %v1114_v32 = vld [vmem:[%s1472_s1 + $0x70] sm:$0xff]  ;;  %v1131_v33 = vld [vmem:[%s1472_s1 + $0xe8] sm:$0xff] }
   0xb   :  { %178 = vmatpush.bf16.msra.mxu1 %v1107_v10  ;;  %v866_v24 = vor.u32 %v1110_v19, %v863_v20  ;;  %v1263_v30 = vld [vmem:[%s1474_s2] sm:$0xff]  ;;  %v1135_v34 = vld [vmem:[%s1472_s1 + $0x108] sm:$0xff]  ;;  %v1293_v37 = vld [vmem:[%s1473_s0 + $0x10] sm:$0xff] }
   0xc   :  { %345 = vmatpush.bf16.msra.mxu2 %v1117_v11  ;;  %47 = vperm.xlu0 %1153, %v1263_v30   ;;  %v1284_v35 = vld [vmem:[%s1474_s2 + $0x8] sm:$0xff]  ;;  %v1130_v40 = vld [vmem:[%s1472_s1 + $0xe0] sm:$0xff]  ;;  %v68_v43 = vunpack.c.h.b16 %v1293_v37  ;;  %v861_v48 = vld [vmem:[%s1473_s0 + $0x18] sm:$0xf]  ;;  %v67_v2 = vunpack.c.l.b16 %v1293_v37 }
   0xd   :  { %367 = vmatpush.bf16.msra.mxu3 %v1121_v12  ;;  %242 = vperm.xlu2 %1155, %v1284_v35   ;;  %v1099_v36 = vld [vmem:[%s1472_s1 + $0x8] sm:$0xff]  ;;  %v1134_v41 = vld [vmem:[%s1472_s1 + $0x100] sm:$0xff]  ;;  %v1147_v50 = vld [vmem:[%s1472_s1 + $0x158] sm:$0xff] }
   0xe   :  { %157 = vmatpush.bf16.msra.mxu0 %v1102_v13  ;;  %v1113_v38 = vld [vmem:[%s1472_s1 + $0x68] sm:$0xff]  ;;  %v1098_v42 = vld [vmem:[%s1472_s1] sm:$0xff]  ;;  %v1151_v51 = vld [vmem:[%s1472_s1 + $0x178] sm:$0xff]  ;;  %v72_v54 = vpack.c.b16 %v68_v43, %v68_v43  ;;  %v71_v9 = vpack.c.b16 %v67_v2, %v67_v2 }
   0xf   :  { %179 = vmatpush.bf16.msra.mxu1 %v1106_v14  ;;  %v1301_v39 = vld [vmem:[%s1473_s0 + $0x28] sm:$0xff]  ;;  %237 = vperm.xlu1 %1154, %v1263_v30   ;;  %v1112_v44 = vld [vmem:[%s1472_s1 + $0x60] sm:$0xff]  ;;  %v1129_v52 = vld [vmem:[%s1472_s1 + $0xd8] sm:$0xff] }
  0x10   :  { %346 = vmatpush.bf16.msra.mxu2 %v1116_v15  ;;  %v776_v45 = vld [vmem:[%s1473_s0] sm:$0xf]  ;;  %v1097_v46 = vld [vmem:[%s1473_s0 + $0x4] sm:$0xf0]  ;;  %v258_v47 = vunpack.c.h.b16 %v1301_v39  ;;  %v1146_v57 = vld [vmem:[%s1472_s1 + $0x150] sm:$0xff]  ;;  %v257_v3 = vunpack.c.l.b16 %v1301_v39 }
  0x11   :  { %368 = vmatpush.bf16.msra.mxu3 %v1120_v18  ;;  %v1111_v49 = vld [vmem:[%s1473_s0 + $0x1c] sm:$0xf0]  ;;  %v777_v53 = vor.u32 %v1097_v46, %v776_v45  ;;  %v1128_v58 = vld [vmem:[%s1472_s1 + $0xd0] sm:$0xff]  ;;  %v1145_v60 = vld [vmem:[%s1472_s1 + $0x148] sm:$0xff] }
  0x12   :  { %830 = vmatmul.msk.bf16.vlgmr.msra.gmra.mxu1 %vm147_vm0, %v781_v23  ;;  %158 = vmatpush.bf16.msra.mxu0 %v1101_v25  ;;  %v862_v55 = vor.u32 %v1111_v49, %v861_v48  ;;  %v262_v56 = vpack.c.b16 %v258_v47, %v258_v47  ;;  %v1150_v59 = vld [vmem:[%s1472_s1 + $0x170] sm:$0xff]  ;;  %v1127_v61 = vld [vmem:[%s1472_s1 + $0xc8] sm:$0xff]  ;;  %v1144_v63 = vld [vmem:[%s1472_s1 + $0x140] sm:$0xff]  ;;  %v261_v11 = vpack.c.b16 %v257_v3, %v257_v3 }
  0x13   :  { %532 = vmatpush.bf16.msrb.mxu1 %v1133_v21  ;;  %v1149_v62 = vld [vmem:[%s1472_s1 + $0x168] sm:$0xff]  ;;  %v1126_v0 = vld [vmem:[%s1472_s1 + $0xc0] sm:$0xff]  ;;  %v949_v4 = vld [vmem:[%s1473_s0 + $0x30] sm:$0xf] }
  0x14   :  { %915 = vmatmul.msk.bf16.vlgmr.msra.gmra.mxu3 %vm147_vm0, %v866_v24  ;;  %347 = vmatpush.bf16.msra.mxu2 %v1115_v26  ;;  %v1148_v1 = vld [vmem:[%s1472_s1 + $0x160] sm:$0xff]  ;;  %v1125_v5 = vld [vmem:[%s1473_s0 + $0x34] sm:$0xf0]  ;;  %v1124_v6 = vld [vmem:[%s1473_s0 + $0x34] sm:$0xf] }
  0x15   :  { %554 = vmatpush.bf16.msrb.mxu3 %v1137_v22  ;;  %52 = vperm.xlu0 %1153, %v1284_v35   ;;  %v951_v7 = vld [vmem:[%s1473_s0 + $0x38] sm:$0xf0]  ;;  %v950_v10 = vor.u32 %v1125_v5, %v949_v4  ;;  %v1142_v13 = vld [vmem:[%s1472_s1 + $0x130] sm:$0xff]  ;;  %v1141_v14 = vld [vmem:[%s1472_s1 + $0x128] sm:$0xff] }
  0x16   :  { %159 = vmatpush.bf16.msra.mxu0 %v1100_v31  ;;  %247 = vperm.xlu2 %1155, %v1252_v27   ;;  %v1143_v8 = vld [vmem:[%s1472_s1 + $0x138] sm:$0xff]  ;;  %v954_v12 = vor.u32 %v1124_v6, %v951_v7  ;;  %v922_v15 = vld [vmem:[%s1473_s0 + $0x40] sm:$0xff]  ;;  %v1037_v19 = vld [vmem:[%s1473_s0 + $0x48] sm:$0xf] }
  0x17   :  { %533 = vmatpush.bf16.msrb.mxu1 %v1132_v28  ;;  %431 = vperm.xlu1 %1154, %v1284_v35   ;;  %v1140_v16 = vld [vmem:[%s1472_s1 + $0x120] sm:$0xff]  ;;  %v446_v17 = vunpack.c.l.b16 %v922_v15  ;;  %v447_v18 = vunpack.c.h.b16 %v922_v15  ;;  %v1139_v20 = vld [vmem:[%s1473_s0 + $0x4c] sm:$0xf0]  ;;  %v1138_v21 = vld [vmem:[%s1473_s0 + $0x4c] sm:$0xf] }
  0x18   :  { %348 = vmatpush.bf16.msra.mxu2 %v1114_v32  ;;  %v1039_v22 = vld [vmem:[%s1473_s0 + $0x50] sm:$0xf0]  ;;  %v1038_v24 = vor.u32 %v1139_v20, %v1037_v19 }
  0x19   :  { %555 = vmatpush.bf16.msrb.mxu3 %v1136_v29  ;;  %v450_v23 = vpack.c.b16 %v446_v17, %v446_v17  ;;  %v451_v25 = vpack.c.b16 %v447_v18, %v447_v18  ;;  %v1042_v26 = vor.u32 %v1138_v21, %v1039_v22 }
  0x1a   :  { %160 = vmatpush.bf16.msra.mxu0 %v1099_v36 }
  0x1b   :  { %534 = vmatpush.bf16.msrb.mxu1 %v1131_v33 }
  0x1c   :  { %349 = vmatpush.bf16.msra.mxu2 %v1113_v38 }
  0x1d   :  { %556 = vmatpush.bf16.msrb.mxu3 %v1135_v34  ;;  %426 = vperm.xlu0 %1153, %v1263_v30  }
  0x1e   :  { %161 = vmatpush.bf16.msra.mxu0 %v1098_v42  ;;  %436 = vperm.xlu2 %1155, %v1252_v27  }
  0x1f   :  { %535 = vmatpush.bf16.msrb.mxu1 %v1130_v40  ;;  %620 = vperm.xlu1 %1154, %v1284_v35  }
  0x20   :  { %350 = vmatpush.bf16.msra.mxu2 %v1112_v44 }
  0x21   :  { %557 = vmatpush.bf16.msrb.mxu3 %v1134_v41  ;;  %162 = vmatmul.bf16.vlgmr.msra.gmra.mxu0 %v777_v53 }
  0x22   :  { %721 = vmatpush.bf16.msrb.mxu0 %v1147_v50  ;;  %831 = vmatmul.msk.bf16.gmra.mxu1 %vm147_vm0, %v72_v54 }
  0x23   :  { %536 = vmatpush.bf16.msrb.mxu1 %v1129_v52  ;;  %351 = vmatmul.bf16.vlgmr.msra.gmra.mxu2 %v862_v55 }
  0x24   :  { %743 = vmatpush.bf16.msrb.mxu2 %v1151_v51  ;;  %916 = vmatmul.msk.bf16.gmra.mxu3 %vm147_vm0, %v262_v56 }
  0x25   :  { %615 = vperm.xlu0 %1153, %v1263_v30  }
  0x26   :  { %722 = vmatpush.bf16.msrb.mxu0 %v1146_v57  ;;  %625 = vperm.xlu2 %1155, %v1252_v27   ;;  %v1010_v27 = vld [vmem:[%s1473_s0 + $0x58] sm:$0xff] }
  0x27   :  { %537 = vmatpush.bf16.msrb.mxu1 %v1128_v58  ;;  %v635_v28 = vunpack.c.l.b16 %v1010_v27  ;;  %v636_v29 = vunpack.c.h.b16 %v1010_v27 }
  0x28   :  { %744 = vmatpush.bf16.msrb.mxu2 %v1150_v59 }
  0x29   :  { %v639_v30 = vpack.c.b16 %v635_v28, %v635_v28  ;;  %v640_v31 = vpack.c.b16 %v636_v29, %v636_v29 }
  0x2a   :  { %723 = vmatpush.bf16.msrb.mxu0 %v1145_v60 }
  0x2b   :  { %538 = vmatpush.bf16.msrb.mxu1 %v1127_v61 }
  0x2c   :  { %745 = vmatpush.bf16.msrb.mxu2 %v1149_v62 }
  0x2e   :  { %724 = vmatpush.bf16.msrb.mxu0 %v1144_v63 }
  0x2f   :  { %539 = vmatpush.bf16.msrb.mxu1 %v1126_v0 }
  0x30   :  { %746 = vmatpush.bf16.msrb.mxu2 %v1148_v1 }
  0x31   :  { %167 = vmatmul.bf16.gmra.mxu0 %v71_v9 }
  0x32   :  { %725 = vmatpush.bf16.msrb.mxu0 %v1143_v8  ;;  %540 = vmatmul.bf16.vlgmr.msrb.gmra.mxu1 %v950_v10 }
  0x33   :  { %356 = vmatmul.bf16.gmra.mxu2 %v261_v11 }
  0x34   :  { %1003 = vmatmul.msk.bf16.vlgmr.msrb.gmra.mxu3 %vm147_vm0, %v954_v12 }
  0x36   :  { %726 = vmatpush.bf16.msrb.mxu0 %v1142_v13 }
  0x3a   :  { %727 = vmatpush.bf16.msrb.mxu0 %v1141_v14 }
  0x3e   :  { %728 = vmatpush.bf16.msrb.mxu0 %v1140_v16 }
  0x41   :  { %729 = vmatmul.bf16.vlgmr.msrb.gmra.mxu0 %v1038_v24 }
  0x42   :  { %545 = vmatmul.bf16.gmra.mxu1 %v450_v23 }
  0x43   :  { %1091 = vmatmul.msk.bf16.vlgmr.msrb.gmra.mxu2 %vm147_vm0, %v1042_v26 }
  0x44   :  { %1004 = vmatmul.msk.bf16.gmra.mxu3 %vm147_vm0, %v451_v25 }
  0x51   :  { %734 = vmatmul.bf16.gmra.mxu0 %v639_v30 }
  0x53   :  { %1092 = vmatmul.msk.bf16.gmra.mxu2 %vm147_vm0, %v640_v31 }
  0x67   :  { %v243_v54 = vpop.permute.xlu2 %242 }
  0x70   :  { %v248_v7 = vpop.permute.xlu2 %247 }
  0x78   :  { %v437_v30 = vpop.permute.xlu2 %436 }
  0x79   :  { %v58_v35 = vpop.permute.xlu1 %57 }
  0x7e   :  { %v48_v36 = vpop.permute.xlu0 %47 }
  0x81   :  { %v238_v43 = vpop.permute.xlu1 %237 }
  0x87   :  { %v53_v44 = vpop.permute.xlu0 %52 }
  0x89   :  { %v432_v18 = vpop.permute.xlu1 %431 }
  0x8f   :  { %v181_v32 = vpop.f32.mrf.mxu1  ;;  %v427_v3 = vpop.permute.xlu0 %426 }
  0x97   :  { %v370_v33 = vpop.f32.mrf.mxu3  ;;  %v183_v34 = vpop.f32.mrf.mxu1 }
  0x98   :  { %v616_v31 = vpop.permute.xlu0 %615 }
  0x9e   :  { %v163_v38 = vpop.f32.mrf.mxu0 }
  0x9f   :  { %v372_v37 = vpop.f32.mrf.mxu3  ;;  %v186_v39 = vpop.f32.mrf.mxu1  ;;  %v164_v40 = vadd.f32 %v163_v38, %v48_v36 }
  0xa1   :  { %v182_v41 = vadd.f32 %v181_v32, %v164_v40 }
  0xa3   :  { %vm190_vm1 = vcmp.ge.f32.partialorder %v182_v41, 0.0  ;;  %v193_v42 = vmul.f32 0.01, %v182_v41 }
  0xa5   :  { %v196_v45 = vsel %vm190_vm1, %v182_v41, %v193_v42 }
  0xa6   :  { %v352_v46 = vpop.f32.mrf.mxu2  ;;  %200 = vst.msk [vmem:[%s1475_s3] sm:$0xff] %vm199_vm2, %v196_v45  ;;  %v165_v49 = vpop.f32.mrf.mxu0 }
  0xa7   :  { %v375_v47 = vpop.f32.mrf.mxu3  ;;  %v353_v48 = vadd.f32 %v352_v46, %v238_v43  ;;  %v188_v50 = vpop.f32.mrf.mxu1  ;;  %v166_v51 = vadd.f32 %v165_v49, %v53_v44 }
  0xa8   :  { %v621_v44 = vpop.permute.xlu1 %620 }
  0xa9   :  { %v371_v52 = vadd.f32 %v370_v33, %v353_v48  ;;  %v184_v53 = vadd.f32 %v183_v34, %v166_v51 }
  0xab   :  { %vm379_vm3 = vcmp.ge.f32.partialorder %v371_v52, 0.0  ;;  %v382_v55 = vmul.f32 0.01, %v371_v52  ;;  %vm191_vm4 = vcmp.ge.f32.partialorder %v184_v53, 0.0  ;;  %v194_v56 = vmul.f32 0.01, %v184_v53 }
  0xad   :  { %v385_v57 = vsel %vm379_vm3, %v371_v52, %v382_v55  ;;  %v197_v58 = vsel %vm191_vm4, %v184_v53, %v194_v56  ;;  %v626_v52 = vpop.permute.xlu2 %625 }
  0xae   :  { %917 = vst.msk [vmem:[%s1475_s3 + $0x18] sm:$0xff] %vm199_vm2, %v385_v57  ;;  %v354_v59 = vpop.f32.mrf.mxu2  ;;  %v168_v62 = vpop.f32.mrf.mxu0 }
  0xaf   :  { %v377_v60 = vpop.f32.mrf.mxu3  ;;  %201 = vst.msk [vmem:[%s1475_s3 + $0x8] sm:$0xff] %vm199_vm2, %v197_v58  ;;  %v355_v61 = vadd.f32 %v354_v59, %v243_v54  ;;  %v541_v63 = vpop.f32.mrf.mxu1  ;;  %v169_v0 = vadd.f32 %v168_v62, %v58_v35 }
  0xb0   :  { %v542_v5 = vadd.f32 %v541_v63, %v427_v3 }
  0xb1   :  { %v373_v1 = vadd.f32 %v372_v37, %v355_v61  ;;  %v187_v2 = vadd.f32 %v186_v39, %v169_v0 }
  0xb3   :  { %vm380_vm5 = vcmp.ge.f32.partialorder %v373_v1, 0.0  ;;  %v383_v4 = vmul.f32 0.01, %v373_v1  ;;  %vm192_vm6 = vcmp.ge.f32.partialorder %v187_v2, 0.0  ;;  %v195_v6 = vmul.f32 0.01, %v187_v2 }
  0xb5   :  { %v386_v8 = vsel %vm380_vm5, %v373_v1, %v383_v4  ;;  %v198_v9 = vsel %vm192_vm6, %v187_v2, %v195_v6 }
  0xb6   :  { %918 = vst.msk [vmem:[%s1475_s3 + $0x20] sm:$0xff] %vm199_vm2, %v386_v8  ;;  %v357_v10 = vpop.f32.mrf.mxu2  ;;  %v170_v14 = vpop.f32.mrf.mxu0 }
  0xb7   :  { %v559_v11 = vpop.f32.mrf.mxu3  ;;  %202 = vst.msk [vmem:[%s1475_s3 + $0x10] sm:$0xff] %vm199_vm2, %v198_v9  ;;  %v358_v12 = vadd.f32 %v357_v10, %v248_v7  ;;  %v543_v15 = vpop.f32.mrf.mxu1 }
  0xb8   :  { %v560_v13 = vadd.f32 %v559_v11, %v542_v5  ;;  %v544_v21 = vadd.f32 %v543_v15, %v432_v18 }
  0xb9   :  { %v376_v16 = vadd.f32 %v375_v47, %v358_v12 }
  0xba   :  { %vm568_vm7 = vcmp.ge.f32.partialorder %v560_v13, 0.0  ;;  %v571_v17 = vmul.f32 0.01, %v560_v13 }
  0xbb   :  { %vm381_vm8 = vcmp.ge.f32.partialorder %v376_v16, 0.0  ;;  %v384_v19 = vmul.f32 0.01, %v376_v16 }
  0xbc   :  { %v574_v20 = vsel %vm568_vm7, %v560_v13, %v571_v17 }
  0xbd   :  { %1005 = vst.msk [vmem:[%s1475_s3 + $0x30] sm:$0xff] %vm199_vm2, %v574_v20  ;;  %v387_v22 = vsel %vm381_vm8, %v376_v16, %v384_v19 }
  0xbe   :  { %919 = vst.msk [vmem:[%s1475_s3 + $0x28] sm:$0xff] %vm199_vm2, %v387_v22  ;;  %v359_v23 = vpop.f32.mrf.mxu2  ;;  %v730_v27 = vpop.f32.mrf.mxu0 }
  0xbf   :  { %v561_v24 = vpop.f32.mrf.mxu3  ;;  %v546_v26 = vpop.f32.mrf.mxu1  ;;  %v731_v33 = vadd.f32 %v730_v27, %v616_v31 }
  0xc0   :  { %v562_v25 = vadd.f32 %v561_v24, %v544_v21  ;;  %v547_v32 = vadd.f32 %v546_v26, %v437_v30 }
  0xc2   :  { %vm569_vm9 = vcmp.ge.f32.partialorder %v562_v25, 0.0  ;;  %v572_v28 = vmul.f32 0.01, %v562_v25 }
  0xc4   :  { %v575_v29 = vsel %vm569_vm9, %v562_v25, %v572_v28 }
  0xc5   :  { %1006 = vst.msk [vmem:[%s1475_s3 + $0x38] sm:$0xff] %vm199_vm2, %v575_v29 }
  0xc6   :  { %v748_v35 = vpop.f32.mrf.mxu2  ;;  %v732_v38 = vpop.f32.mrf.mxu0 }
  0xc7   :  { %v564_v34 = vpop.f32.mrf.mxu3  ;;  %v749_v37 = vadd.f32 %v748_v35, %v731_v33  ;;  %v548_v39 = vpop.f32.mrf.mxu1  ;;  %v733_v45 = vadd.f32 %v732_v38, %v621_v44 }
  0xc8   :  { %v565_v36 = vadd.f32 %v564_v34, %v547_v32 }
  0xc9   :  { %vm757_vm11 = vcmp.ge.f32.partialorder %v749_v37, 0.0  ;;  %v760_v41 = vmul.f32 0.01, %v749_v37 }
  0xca   :  { %vm570_vm10 = vcmp.ge.f32.partialorder %v565_v36, 0.0  ;;  %v573_v40 = vmul.f32 0.01, %v565_v36 }
  0xcb   :  { %v763_v43 = vsel %vm757_vm11, %v749_v37, %v760_v41 }
  0xcc   :  { %v576_v42 = vsel %vm570_vm10, %v565_v36, %v573_v40  ;;  %1093 = vst.msk [vmem:[%s1475_s3 + $0x48] sm:$0xff] %vm199_vm2, %v763_v43 }
  0xcd   :  { %1007 = vst.msk [vmem:[%s1475_s3 + $0x40] sm:$0xff] %vm199_vm2, %v576_v42 }
  0xce   :  { %v750_v46 = vpop.f32.mrf.mxu2  ;;  %v735_v49 = vpop.f32.mrf.mxu0 }
  0xcf   :  { %v566_v47 = vpop.f32.mrf.mxu3  ;;  %v751_v48 = vadd.f32 %v750_v46, %v733_v45  ;;  %v736_v53 = vadd.f32 %v735_v49, %v626_v52 }
  0xd1   :  { %vm758_vm12 = vcmp.ge.f32.partialorder %v751_v48, 0.0  ;;  %v761_v50 = vmul.f32 0.01, %v751_v48 }
  0xd3   :  { %v764_v51 = vsel %vm758_vm12, %v751_v48, %v761_v50 }
  0xd4   :  { %1094 = vst.msk [vmem:[%s1475_s3 + $0x50] sm:$0xff] %vm199_vm2, %v764_v51 }
  0xd6   :  { %v753_v54 = vpop.f32.mrf.mxu2  ;;  %v737_v56 = vpop.f32.mrf.mxu0 }
  0xd7   :  { %v754_v55 = vadd.f32 %v753_v54, %v736_v53 }
  0xd9   :  { %vm759_vm13 = vcmp.ge.f32.partialorder %v754_v55, 0.0  ;;  %v762_v57 = vmul.f32 0.01, %v754_v55 }
  0xdb   :  { %v765_v58 = vsel %vm759_vm13, %v754_v55, %v762_v57 }
  0xdc   :  { %1095 = vst.msk [vmem:[%s1475_s3 + $0x58] sm:$0xff] %vm199_vm2, %v765_v58 }
  0xde   :  { %v755_v59 = vpop.f32.mrf.mxu2 }

// kernel: _lambda_.12
= control target key start
LH: loop header
LB: loop body
LE: loop exit
PB: predicated region body
PF: predicated region fallthrough
CT: control target
= control target key end

     0   :  { %v595_v3 = vmov 0   ;;  %vm82_vm0 = vcmask 785408   ;;  %vm106_vm1 = vcmask 261120   ;;  %vm108_vm8 = vcmask 257024   ;;  %s759_s1 = inlined_call_operand.vmem [shape: bf16[4,96,32], index: 1, kind: input, shape index: {}]   ;;  %s760_s2 = inlined_call_operand.vmem [shape: f32[12,1], index: 2, kind: input, shape index: {}]   ;;  %s761_s0 = inlined_call_operand.vmem [shape: bf16[4,12,96], index: 0, kind: input, shape index: {}]   ;;  %s762_s3 = inlined_call_operand.vmem [shape: f32[4,12,32], index: 3, kind: output, shape index: {}]  }
   0x1   :  { %v569_v0 = vld [vmem:[%s759_s1 + $0x28] sm:$0xff]  ;;  %v576_v1 = vld [vmem:[%s759_s1 + $0x58] sm:$0xff]  ;;  %593 = vset.pattern.permute.xlu1 %v595_v3  ;;  %592 = vset.pattern.permute.xlu0 %v595_v3  ;;  %v568_v5 = vld [vmem:[%s759_s1 + $0x20] sm:$0xff] }
   0x2   :  { %v583_v2 = vld [vmem:[%s759_s1 + $0x88] sm:$0xff]  ;;  %v590_v4 = vld [vmem:[%s759_s1 + $0xb8] sm:$0xff]  ;;  %594 = vset.pattern.permute.xlu2 %v595_v3  ;;  %88 = vmatpush.bf16.msra.mxu0 %v569_v0  ;;  %v575_v6 = vld [vmem:[%s759_s1 + $0x50] sm:$0xff] }
   0x3   :  { %184 = vmatpush.bf16.msra.mxu1 %v576_v1  ;;  %279 = vmatpush.bf16.msra.mxu2 %v583_v2  ;;  %v582_v7 = vld [vmem:[%s759_s1 + $0x80] sm:$0xff]  ;;  %v589_v8 = vld [vmem:[%s759_s1 + $0xb0] sm:$0xff]  ;;  %v567_v10 = vld [vmem:[%s759_s1 + $0x18] sm:$0xff] }
   0x4   :  { %374 = vmatpush.bf16.msra.mxu3 %v590_v4  ;;  %v126_v9 = vld [vmem:[%s760_s2] sm:$0xff]  ;;  %v574_v11 = vld [vmem:[%s759_s1 + $0x48] sm:$0xff]  ;;  %v581_v12 = vld [vmem:[%s759_s1 + $0x78] sm:$0xff] }
   0x5   :  { %v588_v13 = vld [vmem:[%s759_s1 + $0xa8] sm:$0xff]  ;;  %130 = vperm.xlu1 %593, %v126_v9   ;;  %33 = vperm.xlu0 %592, %v126_v9   ;;  %v566_v14 = vld [vmem:[%s759_s1 + $0x10] sm:$0xff]  ;;  %v573_v15 = vld [vmem:[%s759_s1 + $0x40] sm:$0xff] }
   0x6   :  { %89 = vmatpush.bf16.msra.mxu0 %v568_v5  ;;  %225 = vperm.xlu2 %594, %v126_v9   ;;  %v580_v16 = vld [vmem:[%s759_s1 + $0x70] sm:$0xff]  ;;  %v587_v17 = vld [vmem:[%s759_s1 + $0xa0] sm:$0xff]  ;;  %v127_v18 = vld [vmem:[%s760_s2 + $0x8] sm:$0xf] }
   0x7   :  { %185 = vmatpush.bf16.msra.mxu1 %v575_v6  ;;  %280 = vmatpush.bf16.msra.mxu2 %v582_v7  ;;  %v30_v19 = vld [vmem:[%s760_s2 + $0x8] sm:$0xf]  ;;  %v572_v21 = vld [vmem:[%s759_s1 + $0x38] sm:$0xff]  ;;  %v564_v25 = vld [vmem:[%s759_s1] sm:$0xff] }
   0x8   :  { %375 = vmatpush.bf16.msra.mxu3 %v589_v8  ;;  %v565_v20 = vld [vmem:[%s759_s1 + $0x8] sm:$0xff]  ;;  %v586_v24 = vld [vmem:[%s759_s1 + $0x98] sm:$0xff]  ;;  %v571_v26 = vld [vmem:[%s759_s1 + $0x30] sm:$0xff] }
   0x9   :  { %v222_v22 = vld [vmem:[%s760_s2 + $0x8] sm:$0xf]  ;;  %v578_v27 = vld [vmem:[%s759_s1 + $0x60] sm:$0xff]  ;;  %v585_v28 = vld [vmem:[%s759_s1 + $0x90] sm:$0xff] }
   0xa   :  { %90 = vmatpush.bf16.msra.mxu0 %v567_v10  ;;  %v579_v23 = vld [vmem:[%s759_s1 + $0x68] sm:$0xff]  ;;  %v401_v29 = vld [vmem:[%s761_s0] sm:$0xf]  ;;  %v563_v30 = vld [vmem:[%s761_s0] sm:$0x30] }
   0xb   :  { %186 = vmatpush.bf16.msra.mxu1 %v574_v11  ;;  %281 = vmatpush.bf16.msra.mxu2 %v581_v12  ;;  %v444_v31 = vld [vmem:[%s761_s0 + $0x8] sm:$0xf]  ;;  %v570_v32 = vld [vmem:[%s761_s0 + $0x8] sm:$0x30]  ;;  %v489_v33 = vld [vmem:[%s761_s0 + $0x10] sm:$0xf]  ;;  %v402_v37 = vor.u32 %v563_v30, %v401_v29 }
   0xc   :  { %376 = vmatpush.bf16.msra.mxu3 %v588_v13  ;;  %v577_v34 = vld [vmem:[%s761_s0 + $0x10] sm:$0x30]  ;;  %v534_v35 = vld [vmem:[%s761_s0 + $0x18] sm:$0xf]  ;;  %v584_v36 = vld [vmem:[%s761_s0 + $0x18] sm:$0x30]  ;;  %v445_v38 = vor.u32 %v570_v32, %v444_v31 }
   0xd   :  { %135 = vperm.xlu1 %593, %v127_v18   ;;  %38 = vperm.xlu0 %592, %v30_v19   ;;  %v317_v39 = vld [vmem:[%s760_s2 + $0x8] sm:$0xf]  ;;  %v490_v40 = vor.u32 %v577_v34, %v489_v33  ;;  %v535_v41 = vor.u32 %v584_v36, %v534_v35 }
   0xe   :  { %91 = vmatpush.bf16.msra.mxu0 %v566_v14  ;;  %230 = vperm.xlu2 %594, %v222_v22  }
   0xf   :  { %187 = vmatpush.bf16.msra.mxu1 %v573_v15  ;;  %282 = vmatpush.bf16.msra.mxu2 %v580_v16 }
  0x10   :  { %377 = vmatpush.bf16.msra.mxu3 %v587_v17 }
  0x12   :  { %92 = vmatpush.bf16.msra.mxu0 %v565_v20 }
  0x13   :  { %188 = vmatpush.bf16.msra.mxu1 %v572_v21  ;;  %283 = vmatpush.bf16.msra.mxu2 %v579_v23 }
  0x14   :  { %378 = vmatpush.bf16.msra.mxu3 %v586_v24 }
  0x15   :  { %325 = vperm.xlu1 %593, %v317_v39   ;;  %320 = vperm.xlu0 %592, %v126_v9  }
  0x16   :  { %93 = vmatpush.bf16.msra.mxu0 %v564_v25 }
  0x17   :  { %189 = vmatpush.bf16.msra.mxu1 %v571_v26  ;;  %284 = vmatpush.bf16.msra.mxu2 %v578_v27 }
  0x18   :  { %379 = vmatpush.bf16.msra.mxu3 %v585_v28 }
  0x19   :  { %427 = vmatmul.msk.bf16.vlgmr.msra.gmra.mxu0 %vm82_vm0, %v402_v37 }
  0x1a   :  { %470 = vmatmul.msk.bf16.vlgmr.msra.gmra.mxu1 %vm82_vm0, %v445_v38  ;;  %515 = vmatmul.msk.bf16.vlgmr.msra.gmra.mxu2 %vm82_vm0, %v490_v40 }
  0x1b   :  { %560 = vmatmul.msk.bf16.vlgmr.msra.gmra.mxu3 %vm82_vm0, %v535_v41 }
  0x60   :  { %v226_v52 = vpop.permute.xlu2 %225 }
  0x68   :  { %v231_v9 = vpop.permute.xlu2 %230 }
  0x77   :  { %v34_v42 = vpop.permute.xlu0 %33  ;;  %v131_v43 = vpop.permute.xlu1 %130 }
  0x7f   :  { %v39_v44 = vpop.permute.xlu0 %38  ;;  %v136_v51 = vpop.permute.xlu1 %135 }
  0x87   :  { %v321_v55 = vpop.permute.xlu0 %320  ;;  %v326_v8 = vpop.permute.xlu1 %325 }
  0x96   :  { %v95_v45 = vpop.f32.mrf.mxu0 }
  0x97   :  { %v191_v46 = vpop.f32.mrf.mxu1  ;;  %v96_v47 = vadd.f32 %v95_v45, %v34_v42 }
  0x98   :  { %v192_v48 = vadd.f32 %v191_v46, %v131_v43 }
  0x99   :  { %vm100_vm2 = vcmp.ge.f32.partialorder %v96_v47, 0.0  ;;  %v102_v49 = vmul.f32 0.01, %v96_v47 }
  0x9a   :  { %vm196_vm3 = vcmp.ge.f32.partialorder %v192_v48, 0.0  ;;  %v198_v50 = vmul.f32 0.01, %v192_v48 }
  0x9b   :  { %v104_v53 = vsel %vm100_vm2, %v96_v47, %v102_v49 }
  0x9c   :  { %v200_v54 = vsel %vm196_vm3, %v192_v48, %v198_v50  ;;  %107 = vst.msk [vmem:[%s762_s3] sm:$0xff] %vm106_vm1, %v104_v53 }
  0x9d   :  { %471 = vst.msk [vmem:[%s762_s3 + $0x10] sm:$0xff] %vm106_vm1, %v200_v54  ;;  %v286_v56 = vpop.f32.mrf.mxu2 }
  0x9e   :  { %v381_v57 = vpop.f32.mrf.mxu3  ;;  %v287_v58 = vadd.f32 %v286_v56, %v226_v52  ;;  %v97_v60 = vpop.f32.mrf.mxu0 }
  0x9f   :  { %v382_v59 = vadd.f32 %v381_v57, %v321_v55  ;;  %v193_v61 = vpop.f32.mrf.mxu1  ;;  %v98_v62 = vadd.f32 %v97_v60, %v39_v44 }
  0xa0   :  { %v194_v63 = vadd.f32 %v193_v61, %v136_v51  ;;  %vm291_vm4 = vcmp.ge.f32.partialorder %v287_v58, 0.0  ;;  %v293_v0 = vmul.f32 0.01, %v287_v58 }
  0xa1   :  { %vm386_vm5 = vcmp.ge.f32.partialorder %v382_v59, 0.0  ;;  %v388_v1 = vmul.f32 0.01, %v382_v59  ;;  %vm101_vm6 = vcmp.ge.f32.partialorder %v98_v62, 0.0  ;;  %v103_v2 = vmul.f32 0.01, %v98_v62 }
  0xa2   :  { %vm197_vm7 = vcmp.ge.f32.partialorder %v194_v63, 0.0  ;;  %v199_v3 = vmul.f32 0.01, %v194_v63  ;;  %v295_v4 = vsel %vm291_vm4, %v287_v58, %v293_v0 }
  0xa3   :  { %v390_v5 = vsel %vm386_vm5, %v382_v59, %v388_v1  ;;  %516 = vst.msk [vmem:[%s762_s3 + $0x20] sm:$0xff] %vm106_vm1, %v295_v4  ;;  %v105_v6 = vsel %vm101_vm6, %v98_v62, %v103_v2 }
  0xa4   :  { %v201_v7 = vsel %vm197_vm7, %v194_v63, %v199_v3  ;;  %561 = vst.msk [vmem:[%s762_s3 + $0x30] sm:$0xff] %vm106_vm1, %v390_v5 }
  0xa5   :  { %109 = vst.msk [vmem:[%s762_s3 + $0x8] sm:$0xf] %vm108_vm8, %v105_v6  ;;  %v288_v10 = vpop.f32.mrf.mxu2 }
  0xa6   :  { %v383_v11 = vpop.f32.mrf.mxu3  ;;  %472 = vst.msk [vmem:[%s762_s3 + $0x18] sm:$0xf] %vm108_vm8, %v201_v7  ;;  %v289_v12 = vadd.f32 %v288_v10, %v231_v9 }
  0xa7   :  { %v384_v13 = vadd.f32 %v383_v11, %v326_v8 }
  0xa8   :  { %vm292_vm9 = vcmp.ge.f32.partialorder %v289_v12, 0.0  ;;  %v294_v14 = vmul.f32 0.01, %v289_v12 }
  0xa9   :  { %vm387_vm10 = vcmp.ge.f32.partialorder %v384_v13, 0.0  ;;  %v389_v15 = vmul.f32 0.01, %v384_v13 }
  0xaa   :  { %v296_v16 = vsel %vm292_vm9, %v289_v12, %v294_v14 }
  0xab   :  { %v391_v17 = vsel %vm387_vm10, %v384_v13, %v389_v15  ;;  %517 = vst.msk [vmem:[%s762_s3 + $0x28] sm:$0xf] %vm108_vm8, %v296_v16 }
  0xac   :  { %562 = vst.msk [vmem:[%s762_s3 + $0x38] sm:$0xf] %vm108_vm8, %v391_v17 }

// kernel: _lambda_.13
= control target key start
LH: loop header
LB: loop body
LE: loop exit
PB: predicated region body
PF: predicated region fallthrough
CT: control target
= control target key end

     0   :  { %v352_v3 = vmov 0   ;;  %vm46_vm0 = vcmask 392192   ;;  %s445_s1 = inlined_call_operand.vmem [shape: bf16[4,48,128], index: 1, kind: input, shape index: {}]   ;;  %s446_s2 = inlined_call_operand.vmem [shape: f32[3,1], index: 2, kind: input, shape index: {}]   ;;  %s447_s0 = inlined_call_operand.vmem [shape: bf16[4,3,48], index: 0, kind: input, shape index: {}]   ;;  %s448_s3 = inlined_call_operand.vmem [shape: f32[4,3,128], index: 3, kind: output, shape index: {}]  }
   0x1   :  { %v323_v0 = vld [vmem:[%s445_s1 + $0x10] sm:$0xff]  ;;  %v326_v1 = vld [vmem:[%s445_s1 + $0x28] sm:$0xff]  ;;  %v329_v2 = vld [vmem:[%s445_s1 + $0x40] sm:$0xff]  ;;  %335 = vset.pattern.permute.xlu1 %v352_v3  ;;  %334 = vset.pattern.permute.xlu0 %v352_v3 }
   0x2   :  { %v332_v4 = vld [vmem:[%s445_s1 + $0x58] sm:$0xff]  ;;  %55 = vmatpush.bf16.msra.mxu0 %v323_v0  ;;  %111 = vmatpush.bf16.msra.mxu1 %v326_v1  ;;  %v322_v5 = vld [vmem:[%s445_s1 + $0x8] sm:$0xff]  ;;  %v325_v6 = vld [vmem:[%s445_s1 + $0x20] sm:$0xff] }
   0x3   :  { %168 = vmatpush.bf16.msra.mxu2 %v329_v2  ;;  %225 = vmatpush.bf16.msra.mxu3 %v332_v4  ;;  %v328_v7 = vld [vmem:[%s445_s1 + $0x38] sm:$0xff]  ;;  %v331_v8 = vld [vmem:[%s445_s1 + $0x50] sm:$0xff]  ;;  %v136_v9 = vld [vmem:[%s446_s2] sm:$0x7] }
   0x4   :  { %v22_v10 = vld [vmem:[%s446_s2] sm:$0x7]  ;;  %v324_v12 = vld [vmem:[%s445_s1 + $0x18] sm:$0xff]  ;;  %v327_v13 = vld [vmem:[%s445_s1 + $0x30] sm:$0xff]  ;;  %139 = vperm.xlu1 %335, %v136_v9  }
   0x5   :  { %v321_v11 = vld [vmem:[%s445_s1] sm:$0xff]  ;;  %v330_v14 = vld [vmem:[%s445_s1 + $0x48] sm:$0xff]  ;;  %25 = vperm.xlu0 %334, %v22_v10  }
   0x6   :  { %56 = vmatpush.bf16.msra.mxu0 %v322_v5  ;;  %112 = vmatpush.bf16.msra.mxu1 %v325_v6  ;;  %v15_v15 = vld [vmem:[%s447_s0] sm:$0x3]  ;;  %v258_v16 = vld [vmem:[%s447_s0 + $0x2] sm:$0x3]  ;;  %v279_v17 = vld [vmem:[%s447_s0 + $0x4] sm:$0x3] }
   0x7   :  { %169 = vmatpush.bf16.msra.mxu2 %v328_v7  ;;  %226 = vmatpush.bf16.msra.mxu3 %v331_v8  ;;  %v300_v18 = vld [vmem:[%s447_s0 + $0x6] sm:$0x3]  ;;  %v193_v19 = vld [vmem:[%s446_s2] sm:$0x7] }
   0x8   :  { %v79_v20 = vld [vmem:[%s446_s2] sm:$0x7] }
   0xa   :  { %57 = vmatpush.bf16.msra.mxu0 %v321_v11  ;;  %113 = vmatpush.bf16.msra.mxu1 %v324_v12 }
   0xb   :  { %170 = vmatpush.bf16.msra.mxu2 %v327_v13  ;;  %227 = vmatpush.bf16.msra.mxu3 %v330_v14 }
   0xc   :  { %196 = vperm.xlu1 %335, %v193_v19  }
   0xd   :  { %257 = vmatmul.msk.bf16.vlgmr.msra.gmra.mxu0 %vm46_vm0, %v15_v15  ;;  %277 = vmatmul.msk.bf16.vlgmr.msra.gmra.mxu1 %vm46_vm0, %v258_v16 }
   0xe   :  { %298 = vmatmul.msk.bf16.vlgmr.msra.gmra.mxu2 %vm46_vm0, %v279_v17  ;;  %319 = vmatmul.msk.bf16.vlgmr.msra.gmra.mxu3 %vm46_vm0, %v300_v18 }
   0xf   :  { %82 = vperm.xlu0 %334, %v79_v20  }
  0x76   :  { %v140_v22 = vpop.permute.xlu1 %139 }
  0x77   :  { %v26_v21 = vpop.permute.xlu0 %25 }
  0x7e   :  { %v197_v32 = vpop.permute.xlu1 %196 }
  0x81   :  { %v83_v23 = vpop.permute.xlu0 %82 }
  0x8a   :  { %v59_v24 = vpop.f32.mrf.mxu0  ;;  %v115_v25 = vpop.f32.mrf.mxu1 }
  0x8b   :  { %v60_v26 = vadd.f32 %v59_v24, %v26_v21  ;;  %v116_v27 = vadd.f32 %v115_v25, %v83_v23 }
  0x8d   :  { %v63_v28 = vsub.f32 0.0, %v60_v26  ;;  %v119_v29 = vsub.f32 0.0, %v116_v27 }
  0x8f   :  { %v64_v30 = vmul.f32 1.442695, %v63_v28  ;;  %v120_v31 = vmul.f32 1.442695, %v119_v29 }
  0x91   :  { %336 = vpow2.f32 %v64_v30  ;;  %v172_v33 = vpop.f32.mrf.mxu2  ;;  %v229_v34 = vpop.f32.mrf.mxu3 }
  0x92   :  { %338 = vpow2.f32 %v120_v31  ;;  %v173_v35 = vadd.f32 %v172_v33, %v140_v22  ;;  %v230_v36 = vadd.f32 %v229_v34, %v197_v32  ;;  %v61_v37 = vpop.f32.mrf.mxu0  ;;  %v117_v38 = vpop.f32.mrf.mxu1 }
  0x94   :  { %v176_v39 = vsub.f32 0.0, %v173_v35  ;;  %v233_v40 = vsub.f32 0.0, %v230_v36 }
  0x96   :  { %v177_v41 = vmul.f32 1.442695, %v176_v39  ;;  %v234_v42 = vmul.f32 1.442695, %v233_v40 }
  0x97   :  { %v337_v43 = vpop.eup %336 }
  0x98   :  { %v339_v44 = vpop.eup %338  ;;  %v66_v45 = vadd.f32 1.0, %v337_v43  ;;  %340 = vpow2.f32 %v177_v41 }
  0x99   :  { %v122_v46 = vadd.f32 1.0, %v339_v44  ;;  %342 = vpow2.f32 %v234_v42  ;;  %v174_v47 = vpop.f32.mrf.mxu2  ;;  %v231_v48 = vpop.f32.mrf.mxu3 }
  0x9a   :  { %344 = vrcp.f32 %v66_v45 }
  0x9b   :  { %346 = vrcp.f32 %v122_v46 }
  0x9e   :  { %v341_v49 = vpop.eup %340 }
  0x9f   :  { %v343_v50 = vpop.eup %342  ;;  %v179_v51 = vadd.f32 1.0, %v341_v49 }
  0xa0   :  { %v345_v52 = vpop.eup %344  ;;  %v236_v53 = vadd.f32 1.0, %v343_v50 }
  0xa1   :  { %v347_v54 = vpop.eup %346  ;;  %v68_v55 = vmin.f32 %v345_v52, 1.0  ;;  %348 = vrcp.f32 %v179_v51 }
  0xa2   :  { %v124_v56 = vmin.f32 %v347_v54, 1.0  ;;  %350 = vrcp.f32 %v236_v53 }
  0xa3   :  { %69 = vst [vmem:[%s448_s3] sm:$0x7] %v68_v55 }
  0xa4   :  { %278 = vst [vmem:[%s448_s3 + $0x4] sm:$0x7] %v124_v56 }
  0xa7   :  { %v349_v57 = vpop.eup %348 }
  0xa8   :  { %v351_v58 = vpop.eup %350  ;;  %v181_v59 = vmin.f32 %v349_v57, 1.0 }
  0xa9   :  { %v238_v60 = vmin.f32 %v351_v58, 1.0 }
  0xaa   :  { %299 = vst [vmem:[%s448_s3 + $0x8] sm:$0x7] %v181_v59 }
  0xab   :  { %320 = vst [vmem:[%s448_s3 + $0xc] sm:$0x7] %v238_v60 }

</bundles_post_ra>
